<compile_context>
chip_gen: v7x
topology: tpu7x:2x2x1
jax: 0.10.0
libtpu: 0.0.40
codegen_flags: <defaults>
</compile_context>

<pallas_src>
import functools

import jax
import jax.numpy as jnp
from jax import lax
from jax.experimental import pallas as pl
from jax.experimental.pallas import tpu as pltpu


def _round_up(a: int, b: int) -> int:
    return ((a + b - 1) // b) * b


def _mlp_kernel(x_ref, w0_ref, w1_ref, bvec_ref, o_ref, *, n_chunks, chunk):
    """One batch tile.

    x_ref    : (BT, n_in)  row-major batch tile (streamed straight from HBM)
    w0_ref   : (W, n_in)   first Linear weight (PyTorch (out, in) layout)
    w1_ref   : (W, W)      second Linear weight
    bvec_ref : (W, 4)      columns = [b0 | b1 | w_out | b_out(replicated)], f32
    o_ref    : (1, BT)     lane-dense output slab
    """
    w0 = w0_ref[...]
    w1 = w1_ref[...]
    # Hoist the tiny per-feature slices out of the chunk loop.
    b0 = bvec_ref[:, 0:1]          # (W, 1) f32, broadcasts over lanes
    b1 = bvec_ref[:, 1:2]
    wo = bvec_ref[:, 2:3]
    bo = bvec_ref[0:1, 3:4]        # (1, 1) f32

    def body(c, carry):
        off = pl.multiple_of(c * chunk, chunk)
        xc = x_ref[pl.ds(off, chunk), :]                      # (chunk, n_in)

        # Layer 0: h^T = W0 @ xc^T (contract n_in of both operands) -> (W, chunk).
        # Batch stays on the lane axis; no explicit transpose pass over x.
        h = lax.dot_general(w0, xc, (((1,), (1,)), ((), ())),
                            preferred_element_type=jnp.float32)
        h = jnp.maximum(h + b0, 0.0)                          # f32 bias + ReLU

        # Layer 1: h^T = W1 @ h^T -> (W, chunk).
        h = jnp.dot(w1, h.astype(w1.dtype),
                    preferred_element_type=jnp.float32)
        h = jnp.maximum(h + b1, 0.0)

        # Output Linear(W, 1): VPU multiply + sublane reduce -> lane-dense (1, chunk).
        out = jnp.sum(h * wo, axis=0, keepdims=True) + bo
        o_ref[:, pl.ds(off, chunk)] = out.astype(o_ref.dtype)
        return carry

    lax.fori_loop(0, n_chunks, body, 0, unroll=True)


def quantile_network_forward(x, params, *, batch_tile=None, max_batch_tile=4096,
                             min_grid_steps=1, chunk=512):
    """x: [batch, n_in] -> [batch, 1] f32 (QuantileNetworkModule.forward).

    Pass bf16 `x` on v6e/v7x to halve the dominant HBM stream (weights follow
    x.dtype into the MXU; accumulation and the elementwise path stay f32).
    Use min_grid_steps=2 on v7x so the 'parallel' grid axis feeds both cores.
    """
    w0, b0, w1, b1, wo, bo = params   # PyTorch layouts: w0 (W,n_in), b0 (W,), wo (1,W), bo (1,)
    batch, n_in = x.shape
    width = w0.shape[0]

    # ---- batch-aware tiling (few grid steps; chunked inside the kernel) ------
    if batch_tile is None:
        batch_tile = _round_up(pl.cdiv(batch, max(min_grid_steps, 1)), 128)
        batch_tile = min(batch_tile, max_batch_tile)
    chunk = min(chunk, batch_tile)
    assert chunk % 128 == 0 and batch_tile % 128 == 0, \
        "chunk and batch_tile must be multiples of 128 (lane width)"
    batch_tile = _round_up(batch_tile, chunk)       # whole number of chunks
    n_chunks = batch_tile // chunk
    n_tiles = pl.cdiv(batch, batch_tile)            # ragged last tile is fine

    # MXU operand dtype follows x; keep the tiny per-feature vectors in f32.
    mxu_dtype = x.dtype
    w0c = w0.astype(mxu_dtype)
    w1c = w1.astype(mxu_dtype)
    bvec = jnp.stack(
        [b0, b1, wo[0], jnp.broadcast_to(bo, (width,))], axis=1
    ).astype(jnp.float32)                           # (W, 4)

    flops = 2 * batch * (n_in * width + width * width + width)
    bytes_accessed = int(x.size * x.dtype.itemsize + batch * 4
                         + (w0c.size + w1c.size) * jnp.dtype(mxu_dtype).itemsize
                         + bvec.size * 4)

    kernel = functools.partial(_mlp_kernel, n_chunks=n_chunks, chunk=chunk)

    out = pl.pallas_call(
        kernel,
        out_shape=jax.ShapeDtypeStruct((1, batch), jnp.float32),
        grid_spec=pltpu.PrefetchScalarGridSpec(
            num_scalar_prefetch=0,
            grid=(n_tiles,),
            in_specs=[
                pl.BlockSpec((batch_tile, n_in), lambda i: (i, 0)),  # x tile (row-major)
                pl.BlockSpec((width, n_in), lambda i: (0, 0)),       # W0 (resident)
                pl.BlockSpec((width, width), lambda i: (0, 0)),      # W1 (resident)
                pl.BlockSpec((width, 4), lambda i: (0, 0)),          # [b0|b1|wo|bo]
            ],
            out_specs=pl.BlockSpec((1, batch_tile), lambda i: (0, i)),
        ),
        compiler_params=pltpu.CompilerParams(
            dimension_semantics=("parallel",),
        ),
        cost_estimate=pl.CostEstimate(
            flops=flops, transcendentals=0, bytes_accessed=bytes_accessed),
    )(x, w0c, w1c, bvec)

    return out.reshape(batch, 1)


def init_params(key, n_in, width):
    """Synthetic init matching QuantileNetworkModule(n_in, options={'width': width,
    'depth': 2, 'dropout_proportion': 0}) nn.Linear shapes (PyTorch (out,in) layout)."""
    ks = jax.random.split(key, 6)

    def lin(kw, kb, fan_in, fan_out):
        bound = 1.0 / jnp.sqrt(float(fan_in))
        w = jax.random.uniform(kw, (fan_out, fan_in), jnp.float32, -bound, bound)
        b = jax.random.uniform(kb, (fan_out,), jnp.float32, -bound, bound)
        return w, b

    w0, b0 = lin(ks[0], ks[1], n_in, width)
    w1, b1 = lin(ks[2], ks[3], width, width)
    wo, bo = lin(ks[4], ks[5], width, 1)
    return (w0, b0, w1, b1, wo, bo)


def reference_forward(x, params):
    """Plain-JAX reference of the same MLP (PyTorch y = x @ W.T + b semantics)."""
    w0, b0, w1, b1, wo, bo = params
    h = jnp.maximum(x @ w0.T + b0, 0.0)
    h = jnp.maximum(h @ w1.T + b1, 0.0)
    return h @ wo.T + bo


if __name__ == "__main__":
    # Shapes consistent with the module: n_in=8, width=32, depth=2.
    n_in, width = 8, 32
    key = jax.random.PRNGKey(0)
    kx, kp = jax.random.split(key)
    params = init_params(kp, n_in, width)

    # Keep both v7x TensorCores fed; v5e/v6e want the minimum step count.
    try:
        kind = jax.devices()[0].device_kind.lower()
    except Exception:
        kind = ""
    min_grid = 2 if "7" in kind else 1

    fwd = jax.jit(functools.partial(quantile_network_forward,
                                    min_grid_steps=min_grid))

    # f32 path; batch spans multiple in-kernel 512-lane chunks, 1-2 grid steps.
    batch = 2048
    x = jax.random.normal(kx, (batch, n_in), dtype=jnp.float32)
    y = jax.block_until_ready(fwd(x, params))
    y_ref = reference_forward(x, params)
    assert y.shape == (batch, 1)
    assert jnp.allclose(y, y_ref, atol=1e-4, rtol=1e-4), "f32 mismatch vs reference"

    # Ragged batch (not a multiple of 128) exercises the masked-edge DMA path
    # (no wrapper-side padding anymore).
    batch2 = 100
    x2 = jax.random.normal(kx, (batch2, n_in), dtype=jnp.float32)
    y2 = jax.block_until_ready(fwd(x2, params))
    y2_ref = reference_forward(x2, params)
    assert y2.shape == (batch2, 1)
    assert jnp.allclose(y2, y2_ref, atol=1e-4, rtol=1e-4), "ragged mismatch vs reference"

    # bf16-streamed x (v6e/v7x bandwidth path): bf16 MXU inputs, f32 accumulation.
    y3 = jax.block_until_ready(fwd(x.astype(jnp.bfloat16), params))
    assert y3.shape == (batch, 1)
    assert jnp.allclose(y3, y_ref, atol=1e-1, rtol=1e-1), "bf16 mismatch vs reference"

    print("KERNEL_OK")
</pallas_src>

<mosaic_0001>
module attributes {stable_mosaic.version = 11 : i64} {
  func.func @_mlp_kernel(%arg0: i32, %arg1: memref<2048x8xf32, #tpu.memory_space<vmem>>, %arg2: memref<32x8xf32, #tpu.memory_space<vmem>>, %arg3: memref<32x32xf32, #tpu.memory_space<vmem>>, %arg4: memref<32x4xf32, #tpu.memory_space<vmem>>, %arg5: memref<1x2048xf32, #tpu.memory_space<vmem>>) attributes {dimension_semantics = [#tpu.dimension_semantics<parallel>], iteration_bounds = array<i64: 1>, scalar_prefetch = 0 : i64, scratch_operands = 0 : i64, tpu.core_type = #tpu.core_type<tc>, window_params = [{transform_indices = @transform_0, window_bounds = array<i64: 2048, 8>}, {pipeline_mode = #tpu.pipeline_mode<synchronous>, transform_indices = @transform_1, window_bounds = array<i64: 32, 8>}, {pipeline_mode = #tpu.pipeline_mode<synchronous>, transform_indices = @transform_2, window_bounds = array<i64: 32, 32>}, {pipeline_mode = #tpu.pipeline_mode<synchronous>, transform_indices = @transform_3, window_bounds = array<i64: 32, 4>}, {transform_indices = @transform_4, window_bounds = array<i64: 1, 2048>}]} {
    %c0 = arith.constant 0 : index
    %c0_0 = arith.constant 0 : index
    %0 = vector.load %arg2[%c0, %c0_0] : memref<32x8xf32, #tpu.memory_space<vmem>>, vector<32x8xf32>
    %c0_1 = arith.constant 0 : index
    %c0_2 = arith.constant 0 : index
    %1 = vector.load %arg3[%c0_1, %c0_2] : memref<32x32xf32, #tpu.memory_space<vmem>>, vector<32x32xf32>
    %c0_3 = arith.constant 0 : index
    %c0_4 = arith.constant 0 : index
    %2 = vector.load %arg4[%c0_3, %c0_4] : memref<32x4xf32, #tpu.memory_space<vmem>>, vector<32x1xf32>
    %c0_5 = arith.constant 0 : index
    %c1 = arith.constant 1 : index
    %3 = vector.load %arg4[%c0_5, %c1] : memref<32x4xf32, #tpu.memory_space<vmem>>, vector<32x1xf32>
    %c0_6 = arith.constant 0 : index
    %c2 = arith.constant 2 : index
    %4 = vector.load %arg4[%c0_6, %c2] : memref<32x4xf32, #tpu.memory_space<vmem>>, vector<32x1xf32>
    %c0_7 = arith.constant 0 : index
    %c3 = arith.constant 3 : index
    %5 = vector.load %arg4[%c0_7, %c3] : memref<32x4xf32, #tpu.memory_space<vmem>>, vector<1x1xf32>
    %c0_i32 = arith.constant 0 : i32
    %c512_i32 = arith.constant 512 : i32
    %6 = arith.muli %c0_i32, %c512_i32 : i32
    %7 = tpu.assume_multiple %6, 512 : i32
    %8 = arith.index_cast %7 : i32 to index
    %c0_8 = arith.constant 0 : index
    %9 = vector.load %arg1[%8, %c0_8] : memref<2048x8xf32, #tpu.memory_space<vmem>>, vector<512x8xf32>
    %cst = arith.constant dense<0.000000e+00> : vector<32x512xf32>
    %10 = tpu.matmul %0, %9, %cst {dimension_numbers = #tpu.dot_dimension_numbers<[1], [1], [0], [0], [0, 0, 1, 0], [], []>} : vector<32x8xf32>, vector<512x8xf32>, vector<32x512xf32> -> vector<32x512xf32>
    %11 = vector.broadcast %2 : vector<32x1xf32> to vector<32x512xf32>
    %12 = arith.addf %10, %11 : vector<32x512xf32>
    %cst_9 = arith.constant 0.000000e+00 : f32
    %13 = vector.broadcast %cst_9 : f32 to vector<32x512xf32>
    %14 = arith.maximumf %12, %13 : vector<32x512xf32>
    %cst_10 = arith.constant dense<0.000000e+00> : vector<32x512xf32>
    %15 = tpu.matmul %1, %14, %cst_10 {dimension_numbers = #tpu.dot_dimension_numbers<[1], [0], [0], [1], [0, 0, 1, 1], [], []>} : vector<32x32xf32>, vector<32x512xf32>, vector<32x512xf32> -> vector<32x512xf32>
    %16 = vector.broadcast %3 : vector<32x1xf32> to vector<32x512xf32>
    %17 = arith.addf %15, %16 : vector<32x512xf32>
    %cst_11 = arith.constant 0.000000e+00 : f32
    %18 = vector.broadcast %cst_11 : f32 to vector<32x512xf32>
    %19 = arith.maximumf %17, %18 : vector<32x512xf32>
    %20 = vector.broadcast %4 : vector<32x1xf32> to vector<32x512xf32>
    %21 = arith.mulf %19, %20 : vector<32x512xf32>
    %cst_12 = arith.constant dense<0.000000e+00> : vector<512xf32>
    %22 = vector.multi_reduction <add>, %21, %cst_12 [0] : vector<32x512xf32> to vector<512xf32>
    %23 = vector.shape_cast %22 : vector<512xf32> to vector<1x512xf32>
    %24 = vector.broadcast %5 : vector<1x1xf32> to vector<1x512xf32>
    %25 = arith.addf %23, %24 : vector<1x512xf32>
    %c0_13 = arith.constant 0 : index
    %26 = arith.index_cast %7 : i32 to index
    %27 = vector.load %arg5[%c0_13, %26] : memref<1x2048xf32, #tpu.memory_space<vmem>>, vector<1x512xf32>
    tpu.vector_store %arg5[%c0_13, %26], %25 {strides = array<i32>} : memref<1x2048xf32, #tpu.memory_space<vmem>>, vector<1x512xf32>,
    %c1_i32 = arith.constant 1 : i32
    %c512_i32_14 = arith.constant 512 : i32
    %28 = arith.muli %c1_i32, %c512_i32_14 : i32
    %29 = tpu.assume_multiple %28, 512 : i32
    %30 = arith.index_cast %29 : i32 to index
    %c0_15 = arith.constant 0 : index
    %31 = vector.load %arg1[%30, %c0_15] : memref<2048x8xf32, #tpu.memory_space<vmem>>, vector<512x8xf32>
    %cst_16 = arith.constant dense<0.000000e+00> : vector<32x512xf32>
    %32 = tpu.matmul %0, %31, %cst_16 {dimension_numbers = #tpu.dot_dimension_numbers<[1], [1], [0], [0], [0, 0, 1, 0], [], []>} : vector<32x8xf32>, vector<512x8xf32>, vector<32x512xf32> -> vector<32x512xf32>
    %33 = vector.broadcast %2 : vector<32x1xf32> to vector<32x512xf32>
    %34 = arith.addf %32, %33 : vector<32x512xf32>
    %cst_17 = arith.constant 0.000000e+00 : f32
    %35 = vector.broadcast %cst_17 : f32 to vector<32x512xf32>
    %36 = arith.maximumf %34, %35 : vector<32x512xf32>
    %cst_18 = arith.constant dense<0.000000e+00> : vector<32x512xf32>
    %37 = tpu.matmul %1, %36, %cst_18 {dimension_numbers = #tpu.dot_dimension_numbers<[1], [0], [0], [1], [0, 0, 1, 1], [], []>} : vector<32x32xf32>, vector<32x512xf32>, vector<32x512xf32> -> vector<32x512xf32>
    %38 = vector.broadcast %3 : vector<32x1xf32> to vector<32x512xf32>
    %39 = arith.addf %37, %38 : vector<32x512xf32>
    %cst_19 = arith.constant 0.000000e+00 : f32
    %40 = vector.broadcast %cst_19 : f32 to vector<32x512xf32>
    %41 = arith.maximumf %39, %40 : vector<32x512xf32>
    %42 = vector.broadcast %4 : vector<32x1xf32> to vector<32x512xf32>
    %43 = arith.mulf %41, %42 : vector<32x512xf32>
    %cst_20 = arith.constant dense<0.000000e+00> : vector<512xf32>
    %44 = vector.multi_reduction <add>, %43, %cst_20 [0] : vector<32x512xf32> to vector<512xf32>
    %45 = vector.shape_cast %44 : vector<512xf32> to vector<1x512xf32>
    %46 = vector.broadcast %5 : vector<1x1xf32> to vector<1x512xf32>
    %47 = arith.addf %45, %46 : vector<1x512xf32>
    %c0_21 = arith.constant 0 : index
    %48 = arith.index_cast %29 : i32 to index
    %49 = vector.load %arg5[%c0_21, %48] : memref<1x2048xf32, #tpu.memory_space<vmem>>, vector<1x512xf32>
    tpu.vector_store %arg5[%c0_21, %48], %47 {strides = array<i32>} : memref<1x2048xf32, #tpu.memory_space<vmem>>, vector<1x512xf32>,
    %c2_i32 = arith.constant 2 : i32
    %c512_i32_22 = arith.constant 512 : i32
    %50 = arith.muli %c2_i32, %c512_i32_22 : i32
    %51 = tpu.assume_multiple %50, 512 : i32
    %52 = arith.index_cast %51 : i32 to index
    %c0_23 = arith.constant 0 : index
    %53 = vector.load %arg1[%52, %c0_23] : memref<2048x8xf32, #tpu.memory_space<vmem>>, vector<512x8xf32>
    %cst_24 = arith.constant dense<0.000000e+00> : vector<32x512xf32>
    %54 = tpu.matmul %0, %53, %cst_24 {dimension_numbers = #tpu.dot_dimension_numbers<[1], [1], [0], [0], [0, 0, 1, 0], [], []>} : vector<32x8xf32>, vector<512x8xf32>, vector<32x512xf32> -> vector<32x512xf32>
    %55 = vector.broadcast %2 : vector<32x1xf32> to vector<32x512xf32>
    %56 = arith.addf %54, %55 : vector<32x512xf32>
    %cst_25 = arith.constant 0.000000e+00 : f32
    %57 = vector.broadcast %cst_25 : f32 to vector<32x512xf32>
    %58 = arith.maximumf %56, %57 : vector<32x512xf32>
    %cst_26 = arith.constant dense<0.000000e+00> : vector<32x512xf32>
    %59 = tpu.matmul %1, %58, %cst_26 {dimension_numbers = #tpu.dot_dimension_numbers<[1], [0], [0], [1], [0, 0, 1, 1], [], []>} : vector<32x32xf32>, vector<32x512xf32>, vector<32x512xf32> -> vector<32x512xf32>
    %60 = vector.broadcast %3 : vector<32x1xf32> to vector<32x512xf32>
    %61 = arith.addf %59, %60 : vector<32x512xf32>
    %cst_27 = arith.constant 0.000000e+00 : f32
    %62 = vector.broadcast %cst_27 : f32 to vector<32x512xf32>
    %63 = arith.maximumf %61, %62 : vector<32x512xf32>
    %64 = vector.broadcast %4 : vector<32x1xf32> to vector<32x512xf32>
    %65 = arith.mulf %63, %64 : vector<32x512xf32>
    %cst_28 = arith.constant dense<0.000000e+00> : vector<512xf32>
    %66 = vector.multi_reduction <add>, %65, %cst_28 [0] : vector<32x512xf32> to vector<512xf32>
    %67 = vector.shape_cast %66 : vector<512xf32> to vector<1x512xf32>
    %68 = vector.broadcast %5 : vector<1x1xf32> to vector<1x512xf32>
    %69 = arith.addf %67, %68 : vector<1x512xf32>
    %c0_29 = arith.constant 0 : index
    %70 = arith.index_cast %51 : i32 to index
    %71 = vector.load %arg5[%c0_29, %70] : memref<1x2048xf32, #tpu.memory_space<vmem>>, vector<1x512xf32>
    tpu.vector_store %arg5[%c0_29, %70], %69 {strides = array<i32>} : memref<1x2048xf32, #tpu.memory_space<vmem>>, vector<1x512xf32>,
    %c3_i32 = arith.constant 3 : i32
    %c512_i32_30 = arith.constant 512 : i32
    %72 = arith.muli %c3_i32, %c512_i32_30 : i32
    %73 = tpu.assume_multiple %72, 512 : i32
    %74 = arith.index_cast %73 : i32 to index
    %c0_31 = arith.constant 0 : index
    %75 = vector.load %arg1[%74, %c0_31] : memref<2048x8xf32, #tpu.memory_space<vmem>>, vector<512x8xf32>
    %cst_32 = arith.constant dense<0.000000e+00> : vector<32x512xf32>
    %76 = tpu.matmul %0, %75, %cst_32 {dimension_numbers = #tpu.dot_dimension_numbers<[1], [1], [0], [0], [0, 0, 1, 0], [], []>} : vector<32x8xf32>, vector<512x8xf32>, vector<32x512xf32> -> vector<32x512xf32>
    %77 = vector.broadcast %2 : vector<32x1xf32> to vector<32x512xf32>
    %78 = arith.addf %76, %77 : vector<32x512xf32>
    %cst_33 = arith.constant 0.000000e+00 : f32
    %79 = vector.broadcast %cst_33 : f32 to vector<32x512xf32>
    %80 = arith.maximumf %78, %79 : vector<32x512xf32>
    %cst_34 = arith.constant dense<0.000000e+00> : vector<32x512xf32>
    %81 = tpu.matmul %1, %80, %cst_34 {dimension_numbers = #tpu.dot_dimension_numbers<[1], [0], [0], [1], [0, 0, 1, 1], [], []>} : vector<32x32xf32>, vector<32x512xf32>, vector<32x512xf32> -> vector<32x512xf32>
    %82 = vector.broadcast %3 : vector<32x1xf32> to vector<32x512xf32>
    %83 = arith.addf %81, %82 : vector<32x512xf32>
    %cst_35 = arith.constant 0.000000e+00 : f32
    %84 = vector.broadcast %cst_35 : f32 to vector<32x512xf32>
    %85 = arith.maximumf %83, %84 : vector<32x512xf32>
    %86 = vector.broadcast %4 : vector<32x1xf32> to vector<32x512xf32>
    %87 = arith.mulf %85, %86 : vector<32x512xf32>
    %cst_36 = arith.constant dense<0.000000e+00> : vector<512xf32>
    %88 = vector.multi_reduction <add>, %87, %cst_36 [0] : vector<32x512xf32> to vector<512xf32>
    %89 = vector.shape_cast %88 : vector<512xf32> to vector<1x512xf32>
    %90 = vector.broadcast %5 : vector<1x1xf32> to vector<1x512xf32>
    %91 = arith.addf %89, %90 : vector<1x512xf32>
    %c0_37 = arith.constant 0 : index
    %92 = arith.index_cast %73 : i32 to index
    %93 = vector.load %arg5[%c0_37, %92] : memref<1x2048xf32, #tpu.memory_space<vmem>>, vector<1x512xf32>
    tpu.vector_store %arg5[%c0_37, %92], %91 {strides = array<i32>} : memref<1x2048xf32, #tpu.memory_space<vmem>>, vector<1x512xf32>,
    %c4_i32 = arith.constant 4 : i32
    return
  }
  func.func @transform_0(%arg0: i32) -> (i32, i32) {
    %c0_i32 = arith.constant 0 : i32
    %c0_i32_0 = arith.constant 0 : i32
    return %arg0, %c0_i32 : i32, i32
  }
  func.func @transform_1(%arg0: i32) -> (i32, i32) {
    %c0_i32 = arith.constant 0 : i32
    %c0_i32_0 = arith.constant 0 : i32
    %c0_i32_1 = arith.constant 0 : i32
    return %c0_i32, %c0_i32_0 : i32, i32
  }
  func.func @transform_2(%arg0: i32) -> (i32, i32) {
    %c0_i32 = arith.constant 0 : i32
    %c0_i32_0 = arith.constant 0 : i32
    %c0_i32_1 = arith.constant 0 : i32
    return %c0_i32, %c0_i32_0 : i32, i32
  }
  func.func @transform_3(%arg0: i32) -> (i32, i32) {
    %c0_i32 = arith.constant 0 : i32
    %c0_i32_0 = arith.constant 0 : i32
    %c0_i32_1 = arith.constant 0 : i32
    return %c0_i32, %c0_i32_0 : i32, i32
  }
  func.func @transform_4(%arg0: i32) -> (i32, i32) {
    %c0_i32 = arith.constant 0 : i32
    %c0_i32_0 = arith.constant 0 : i32
    return %c0_i32, %arg0 : i32, i32
  }
}

</mosaic_0001>

<bundles_post_ra>
// kernel: quantile_network_forward.1
= control target key start
LH: loop header
LB: loop body
LE: loop exit
PB: predicated region body
PF: predicated region fallthrough
CT: control target
= control target key end

     0   :  { %vm115_vm0 = vcmask 64512   ;;  %v4384_v7 = vmov 0   ;;  %s6057_s0 = inlined_call_operand.vmem [shape: f32[2048,8], index: 0, kind: input, shape index: {}]   ;;  %s6058_s1 = inlined_call_operand.vmem [shape: f32[32,8], index: 1, kind: input, shape index: {}]   ;;  %s6059_s2 = inlined_call_operand.vmem [shape: f32[32,32], index: 2, kind: input, shape index: {}]   ;;  %s6060_s3 = inlined_call_operand.vmem [shape: f32[32,4], index: 3, kind: input, shape index: {}]   ;;  %s6061_s4 = inlined_call_operand.hbm [shape: f32[1,2048], index: 4, kind: output, shape index: {}]  }
   0x1   :  { %v47_v0 = vld [vmem:[%s6057_s0 + $0x80] sm:$0xff]  ;;  %v48_v1 = vld [vmem:[%s6057_s0 + $0x88] sm:$0xff]  ;;  %vm4427_vm1 = vmpackc.low %vm115_vm0, %vm115_vm0  ;;  %4345 = vset.pattern.permute.xlu0 %v4384_v7  ;;  %4346 = vset.pattern.permute.xlu1 %v4384_v7 }
   0x2   :  { %v79_v2 = vld [vmem:[%s6057_s0 + $0x180] sm:$0xff]  ;;  %v3890_v3 = vpack.c.bf16 %v48_v1, %v47_v0  ;;  %v80_v5 = vld [vmem:[%s6057_s0 + $0x188] sm:$0xff]  ;;  %v49_v14 = vld [vmem:[%s6057_s0 + $0x90] sm:$0xff] }
   0x3   :  { %v31_v6 = vld [vmem:[%s6057_s0] sm:$0xff]  ;;  %v3938_v8 = vpack.c.bf16 %v80_v5, %v79_v2  ;;  %v32_v9 = vld [vmem:[%s6057_s0 + $0x8] sm:$0xff]  ;;  %v50_v15 = vld [vmem:[%s6057_s0 + $0x98] sm:$0xff] }
   0x4   :  { %v63_v10 = vld [vmem:[%s6057_s0 + $0x100] sm:$0xff]  ;;  %v64_v11 = vld [vmem:[%s6057_s0 + $0x108] sm:$0xff]  ;;  %3892 = vmatprep.subr.msk.bf16.mxu0 %vm4427_vm1, %v3890_v3  ;;  %v3893_v12 = vpack.c.bf16 %v32_v9, %v31_v6  ;;  %v81_v16 = vld [vmem:[%s6057_s0 + $0x190] sm:$0xff]  ;;  %v3896_v17 = vpack.c.bf16 %v50_v15, %v49_v14 }
   0x5   :  { %v3941_v13 = vpack.c.bf16 %v64_v11, %v63_v10  ;;  %3940 = vmatprep.subr.msk.bf16.mxu1 %vm4427_vm1, %v3938_v8  ;;  %v82_v18 = vld [vmem:[%s6057_s0 + $0x198] sm:$0xff]  ;;  %v33_v20 = vld [vmem:[%s6057_s0 + $0x10] sm:$0xff]  ;;  %v51_v24 = vld [vmem:[%s6057_s0 + $0xa0] sm:$0xff] }
   0x6   :  { %3895 = vmatpush3.bf16.xpose.msk.msra.mxu0 %vm4427_vm1, %v3893_v12  ;;  %v3944_v19 = vpack.c.bf16 %v82_v18, %v81_v16  ;;  %v34_v21 = vld [vmem:[%s6057_s0 + $0x18] sm:$0xff]  ;;  %v65_v22 = vld [vmem:[%s6057_s0 + $0x110] sm:$0xff]  ;;  %v52_v25 = vld [vmem:[%s6057_s0 + $0xa8] sm:$0xff] }
   0x7   :  { %3943 = vmatpush3.bf16.xpose.msk.msra.mxu1 %vm4427_vm1, %v3941_v13  ;;  %3898 = vmatprep.subr.msk.bf16.mxu0 %vm4427_vm1, %v3896_v17  ;;  %v66_v23 = vld [vmem:[%s6057_s0 + $0x118] sm:$0xff]  ;;  %v83_v26 = vld [vmem:[%s6057_s0 + $0x1a0] sm:$0xff]  ;;  %v84_v27 = vld [vmem:[%s6057_s0 + $0x1a8] sm:$0xff]  ;;  %v3899_v28 = vpack.c.bf16 %v34_v21, %v33_v20  ;;  %v3902_v30 = vpack.c.bf16 %v52_v25, %v51_v24 }
   0x8   :  { %3946 = vmatprep.subr.msk.bf16.mxu1 %vm4427_vm1, %v3944_v19  ;;  %v3947_v29 = vpack.c.bf16 %v66_v23, %v65_v22  ;;  %v3950_v31 = vpack.c.bf16 %v84_v27, %v83_v26  ;;  %v35_v32 = vld [vmem:[%s6057_s0 + $0x20] sm:$0xff]  ;;  %v36_v33 = vld [vmem:[%s6057_s0 + $0x28] sm:$0xff]  ;;  %v53_v36 = vld [vmem:[%s6057_s0 + $0xb0] sm:$0xff] }
   0x9   :  { %v67_v34 = vld [vmem:[%s6057_s0 + $0x120] sm:$0xff]  ;;  %v68_v35 = vld [vmem:[%s6057_s0 + $0x128] sm:$0xff]  ;;  %v54_v37 = vld [vmem:[%s6057_s0 + $0xb8] sm:$0xff]  ;;  %v3905_v40 = vpack.c.bf16 %v36_v33, %v35_v32 }
   0xa   :  { %v85_v38 = vld [vmem:[%s6057_s0 + $0x1b0] sm:$0xff]  ;;  %v86_v39 = vld [vmem:[%s6057_s0 + $0x1b8] sm:$0xff]  ;;  %v3953_v41 = vpack.c.bf16 %v68_v35, %v67_v34  ;;  %v3908_v42 = vpack.c.bf16 %v54_v37, %v53_v36  ;;  %v4545_v48 = vld [vmem:[%s6058_s1] sm:$0xff] }
   0xb   :  { %v3956_v43 = vpack.c.bf16 %v86_v39, %v85_v38  ;;  %v37_v44 = vld [vmem:[%s6057_s0 + $0x30] sm:$0xff]  ;;  %v38_v45 = vld [vmem:[%s6057_s0 + $0x38] sm:$0xff]  ;;  %v55_v49 = vld [vmem:[%s6057_s0 + $0xc0] sm:$0xff]  ;;  %3602 = vmatprep.mubr.msk.f32.mxu0 %vm115_vm0, %v4545_v48  ;;  %3642 = vmatprep.mubr.msk.f32.mxu1 %vm115_vm0, %v4545_v48 }
   0xc   :  { %v69_v46 = vld [vmem:[%s6057_s0 + $0x130] sm:$0xff]  ;;  %v70_v47 = vld [vmem:[%s6057_s0 + $0x138] sm:$0xff]  ;;  %v56_v50 = vld [vmem:[%s6057_s0 + $0xc8] sm:$0xff] }
   0xd   :  { %v87_v51 = vld [vmem:[%s6057_s0 + $0x1c0] sm:$0xff]  ;;  %v88_v52 = vld [vmem:[%s6057_s0 + $0x1c8] sm:$0xff]  ;;  %v4575_v54 = vld [vmem:[%s6060_s3 + $0x10] sm:$0xff] }
   0xe   :  { %3901 = vmatpush3.bf16.xpose.msk.msra.mxu0 %vm4427_vm1, %v3899_v28  ;;  %v4570_v53 = vld [vmem:[%s6060_s3] sm:$0xff]  ;;  %107 = vperm.xlu1 %4346, %v4575_v54  }
   0xf   :  { %3949 = vmatpush3.bf16.xpose.msk.msra.mxu1 %vm4427_vm1, %v3947_v29  ;;  %3904 = vmatprep.subr.msk.bf16.mxu0 %vm4427_vm1, %v3902_v30 }
  0x10   :  { %3952 = vmatprep.subr.msk.bf16.mxu1 %vm4427_vm1, %v3950_v31  ;;  %97 = vperm.xlu0 %4345, %v4570_v53  }
  0x16   :  { %3907 = vmatpush3.bf16.xpose.msk.msra.mxu0 %vm4427_vm1, %v3905_v40 }
  0x17   :  { %3955 = vmatpush3.bf16.xpose.msk.msra.mxu1 %vm4427_vm1, %v3953_v41  ;;  %3910 = vmatprep.subr.msk.bf16.mxu0 %vm4427_vm1, %v3908_v42 }
  0x18   :  { %3958 = vmatprep.subr.msk.bf16.mxu1 %vm4427_vm1, %v3956_v43 }
  0x19   :  { %9 = vsyncpa [#allocation3], 0  ;;  %v3911_v55 = vpack.c.bf16 %v38_v45, %v37_v44  ;;  %v3959_v56 = vpack.c.bf16 %v70_v47, %v69_v46  ;;  %v4582_v57 = vld [vmem:[%s6060_s3 + $0x8] sm:$0xff]  ;;  %v4587_v58 = vld [vmem:[%s6060_s3 + $0x18] sm:$0xff]  ;;  %v3914_v59 = vpack.c.bf16 %v56_v50, %v55_v49  ;;  %v3962_v60 = vpack.c.bf16 %v88_v52, %v87_v51 }
  0x1a   :  { %102 = vperm.xlu0 %4345, %v4582_v57   ;;  %112 = vperm.xlu1 %4346, %v4587_v58   ;;  %v39_v61 = vld [vmem:[%s6057_s0 + $0x40] sm:$0xff]  ;;  %v40_v62 = vld [vmem:[%s6057_s0 + $0x48] sm:$0xff]  ;;  %v57_v1 = vld [vmem:[%s6057_s0 + $0xd0] sm:$0xff]  ;;  %v4385_v43 = vmov 0.0   ;;  %v4386_v44 = vmov 1   ;;  %v4387_v45 = vmov 2  }
  0x1b   :  { %v71_v63 = vld [vmem:[%s6057_s0 + $0x140] sm:$0xff]  ;;  %v72_v0 = vld [vmem:[%s6057_s0 + $0x148] sm:$0xff]  ;;  %v58_v2 = vld [vmem:[%s6057_s0 + $0xd8] sm:$0xff]  ;;  %v3917_v6 = vpack.c.bf16 %v40_v62, %v39_v61  ;;  %v4388_v47 = vmov 3   ;;  %vm530_vm2 = vcmask 261120  }
  0x1c   :  { %v89_v3 = vld [vmem:[%s6057_s0 + $0x1d0] sm:$0xff]  ;;  %v90_v5 = vld [vmem:[%s6057_s0 + $0x1d8] sm:$0xff]  ;;  %v3965_v7 = vpack.c.bf16 %v72_v0, %v71_v63  ;;  %v3920_v8 = vpack.c.bf16 %v58_v2, %v57_v1  ;;  %v59_v14 = vld [vmem:[%s6057_s0 + $0xe0] sm:$0xff] }
  0x1d   :  { %v3968_v9 = vpack.c.bf16 %v90_v5, %v89_v3  ;;  %v41_v10 = vld [vmem:[%s6057_s0 + $0x50] sm:$0xff]  ;;  %v42_v11 = vld [vmem:[%s6057_s0 + $0x58] sm:$0xff]  ;;  %v60_v15 = vld [vmem:[%s6057_s0 + $0xe8] sm:$0xff] }
  0x1e   :  { %3913 = vmatpush3.bf16.xpose.msk.msra.mxu0 %vm4427_vm1, %v3911_v55  ;;  %v73_v12 = vld [vmem:[%s6057_s0 + $0x150] sm:$0xff]  ;;  %v74_v13 = vld [vmem:[%s6057_s0 + $0x158] sm:$0xff]  ;;  %v91_v16 = vld [vmem:[%s6057_s0 + $0x1e0] sm:$0xff]  ;;  %v3923_v18 = vpack.c.bf16 %v42_v11, %v41_v10  ;;  %v3926_v20 = vpack.c.bf16 %v60_v15, %v59_v14  ;;  %4348 = vset.pattern.permute.xlu1 %v4386_v44 }
  0x1f   :  { %3961 = vmatpush3.bf16.xpose.msk.msra.mxu1 %vm4427_vm1, %v3959_v56  ;;  %3916 = vmatprep.subr.msk.bf16.mxu0 %vm4427_vm1, %v3914_v59  ;;  %v92_v17 = vld [vmem:[%s6057_s0 + $0x1e8] sm:$0xff]  ;;  %v3971_v19 = vpack.c.bf16 %v74_v13, %v73_v12  ;;  %v43_v22 = vld [vmem:[%s6057_s0 + $0x60] sm:$0xff]  ;;  %v61_v26 = vld [vmem:[%s6057_s0 + $0xf0] sm:$0xff] }
  0x20   :  { %3964 = vmatprep.subr.msk.bf16.mxu1 %vm4427_vm1, %v3962_v60  ;;  %v3974_v21 = vpack.c.bf16 %v92_v17, %v91_v16  ;;  %v44_v23 = vld [vmem:[%s6057_s0 + $0x68] sm:$0xff]  ;;  %v75_v24 = vld [vmem:[%s6057_s0 + $0x160] sm:$0xff]  ;;  %v62_v27 = vld [vmem:[%s6057_s0 + $0xf8] sm:$0xff]  ;;  %4347 = vset.pattern.permute.xlu0 %v4386_v44 }
  0x21   :  { %v76_v25 = vld [vmem:[%s6057_s0 + $0x168] sm:$0xff]  ;;  %v93_v28 = vld [vmem:[%s6057_s0 + $0x1f0] sm:$0xff]  ;;  %v94_v29 = vld [vmem:[%s6057_s0 + $0x1f8] sm:$0xff]  ;;  %v3929_v30 = vpack.c.bf16 %v44_v23, %v43_v22  ;;  %v3932_v32 = vpack.c.bf16 %v62_v27, %v61_v26  ;;  %519 = vperm.xlu1 %4348, %v4582_v57   ;;  %515 = vperm.xlu0 %4347, %v4570_v53  }
  0x22   :  { %v3977_v31 = vpack.c.bf16 %v76_v25, %v75_v24  ;;  %v3980_v33 = vpack.c.bf16 %v94_v29, %v93_v28  ;;  %v45_v34 = vld [vmem:[%s6057_s0 + $0x70] sm:$0xff]  ;;  %v46_v35 = vld [vmem:[%s6057_s0 + $0x78] sm:$0xff]  ;;  %v4714_v40 = vld [vmem:[%s6058_s1 + $0x8] sm:$0xff] }
  0x23   :  { %v77_v36 = vld [vmem:[%s6057_s0 + $0x170] sm:$0xff]  ;;  %v78_v37 = vld [vmem:[%s6057_s0 + $0x178] sm:$0xff]  ;;  %v3935_v38 = vpack.c.bf16 %v46_v35, %v45_v34  ;;  %v30_v46 = vld [vmem:[%s6060_s3] sm:$0x1] }
  0x24   :  { %v3983_v39 = vpack.c.bf16 %v78_v37, %v77_v36  ;;  %v4727_v41 = vld [vmem:[%s6058_s1 + $0x10] sm:$0xff]  ;;  %v4740_v42 = vld [vmem:[%s6058_s1 + $0x18] sm:$0xff]  ;;  %v3154_v34 = vld [vmem:[%s6057_s0 + $0x280] sm:$0xff] }
  0x25   :  { %523 = vperm.xlu1 %4348, %v4575_v54   ;;  %527 = vperm.xlu0 %4347, %v4587_v58   ;;  %v3155_v35 = vld [vmem:[%s6057_s0 + $0x288] sm:$0xff]  ;;  %v3186_v44 = vld [vmem:[%s6057_s0 + $0x380] sm:$0xff] }
  0x26   :  { %3919 = vmatpush3.bf16.xpose.msk.msra.mxu0 %vm4427_vm1, %v3917_v6 }
  0x27   :  { %3967 = vmatpush3.bf16.xpose.msk.msra.mxu1 %vm4427_vm1, %v3965_v7  ;;  %3922 = vmatprep.subr.msk.bf16.mxu0 %vm4427_vm1, %v3920_v8 }
  0x28   :  { %3970 = vmatprep.subr.msk.bf16.mxu1 %vm4427_vm1, %v3968_v9 }
  0x29   :  { %4349 = vset.pattern.permute.xlu1 %v4387_v45  ;;  %4350 = vset.pattern.permute.xlu0 %v4387_v45  ;;  %v3187_v45 = vld [vmem:[%s6057_s0 + $0x388] sm:$0xff] }
  0x2a   :  { %738 = vperm.xlu1 %4349, %v4570_v53   ;;  %742 = vperm.xlu0 %4350, %v4582_v57  }
  0x2e   :  { %3925 = vmatpush3.bf16.xpose.msk.msra.mxu0 %vm4427_vm1, %v3923_v18  ;;  %746 = vperm.xlu1 %4349, %v4575_v54  }
  0x2f   :  { %3973 = vmatpush3.bf16.xpose.msk.msra.mxu1 %vm4427_vm1, %v3971_v19  ;;  %3928 = vmatprep.subr.msk.bf16.mxu0 %vm4427_vm1, %v3926_v20 }
  0x30   :  { %3976 = vmatprep.subr.msk.bf16.mxu1 %vm4427_vm1, %v3974_v21  ;;  %4351 = vset.pattern.permute.xlu0 %v4388_v47 }
  0x31   :  { %807 = vperm.xlu0 %4351, %v30_v46  }
  0x32   :  { %750 = vperm.xlu1 %4349, %v4587_v58  }
  0x36   :  { %3931 = vmatpush3.bf16.xpose.msk.msra.mxu0 %vm4427_vm1, %v3929_v30 }
  0x37   :  { %3979 = vmatpush3.bf16.xpose.msk.msra.mxu1 %vm4427_vm1, %v3977_v31  ;;  %3934 = vmatprep.subr.msk.bf16.mxu0 %vm4427_vm1, %v3932_v32 }
  0x38   :  { %3982 = vmatprep.subr.msk.bf16.mxu1 %vm4427_vm1, %v3980_v33 }
  0x3e   :  { %3937 = vmatpush3.bf16.xpose.msk.msra.mxu0 %vm4427_vm1, %v3935_v38 }
  0x3f   :  { %3985 = vmatpush3.bf16.xpose.msk.msra.mxu1 %vm4427_vm1, %v3983_v39 }
  0x45   :  { %3603 = vmatmul.mubr.msk.f32.vlgmr.msra.gmra.mrb[0].mxu0 %vm115_vm0, %v4545_v48 }
  0x46   :  { %3643 = vmatmul.mubr.msk.f32.vlgmr.msra.gmra.mrb[0].mxu1 %vm115_vm0, %v4545_v48  ;;  %3604 = vmatprep.mubr.msk.f32.mxu0 %vm115_vm0, %v4714_v40 }
  0x47   :  { %3644 = vmatprep.mubr.msk.f32.mxu1 %vm115_vm0, %v4714_v40 }
  0x49   :  { %3605 = vmatmul.mubr.msk.f32.gmra.mrb[2].mxu0 %vm115_vm0, %v4714_v40 }
  0x4a   :  { %3645 = vmatmul.mubr.msk.f32.gmra.mrb[2].mxu1 %vm115_vm0, %v4714_v40  ;;  %3606 = vmatprep.mubr.msk.f32.mxu0 %vm115_vm0, %v4727_v41 }
  0x4b   :  { %3646 = vmatprep.mubr.msk.f32.mxu1 %vm115_vm0, %v4727_v41 }
  0x4d   :  { %3607 = vmatmul.mubr.msk.f32.gmra.mrb[4].mxu0 %vm115_vm0, %v4727_v41 }
  0x4e   :  { %3647 = vmatmul.mubr.msk.f32.gmra.mrb[4].mxu1 %vm115_vm0, %v4727_v41  ;;  %3608 = vmatprep.mubr.msk.f32.mxu0 %vm115_vm0, %v4740_v42 }
  0x4f   :  { %3648 = vmatprep.mubr.msk.f32.mxu1 %vm115_vm0, %v4740_v42 }
  0x51   :  { %3609 = vmatmul.mubr.msk.f32.gmra.mrb[6].mxu0 %vm115_vm0, %v4740_v42 }
  0x52   :  { %3649 = vmatmul.mubr.msk.f32.gmra.mrb[6].mxu1 %vm115_vm0, %v4740_v42  ;;  %607 = vmatprep.mubr.f32.mxu0 %v4385_v43 }
  0x53   :  { %696 = vmatprep.mubr.f32.mxu1 %v4385_v43 }
  0x8d   :  { %v4773_v59 = vpop.permute.xlu1 %107 }
  0x8f   :  { %v4766_v49 = vpop.permute.xlu0 %97 }
  0x99   :  { %v4769_v53 = vpop.permute.xlu0 %102  ;;  %v4783_v23 = vpop.permute.xlu1 %112 }
 0x118   :  { %v386_v50 = vpop.f32.mrb[0].mxu0 }
 0x119   :  { %v475_v51 = vpop.f32.mrb[0].mxu1  ;;  %v388_v52 = vpop.f32.mrb[1].mxu0  ;;  %v387_v56 = vadd.f32 %v386_v50, %v4766_v49 }
 0x11a   :  { %v477_v55 = vpop.f32.mrb[1].mxu1  ;;  %v476_v57 = vadd.f32 %v475_v51, %v4766_v49  ;;  %v389_v54 = vadd.f32 %v388_v52, %v4766_v49 }
 0x11b   :  { %v478_v60 = vadd.f32 %v477_v55, %v4766_v49  ;;  %v498_v5 = vmax.f32 %v387_v56, 0.0 }
 0x11c   :  { %v392_v61 = vpop.f32.mrb[2].mxu0  ;;  %v500_v6 = vmax.f32 %v476_v57, 0.0  ;;  %v499_v9 = vmax.f32 %v389_v54, 0.0  ;;  %v4002_v54 = vpack.c.bf16 %v3155_v35, %v3154_v34 }
 0x11d   :  { %v481_v62 = vpop.f32.mrb[2].mxu1  ;;  %v393_v58 = vadd.f32 %v392_v61, %v4769_v53  ;;  %v394_v0 = vpop.f32.mrb[3].mxu0  ;;  %v501_v10 = vmax.f32 %v478_v60, 0.0  ;;  %v4050_v60 = vpack.c.bf16 %v3187_v45, %v3186_v44  ;;  %v4806_v61 = vld [vmem:[%s6059_s2] sm:$0xff]  ;;  %v3176_v44 = vld [vmem:[%s6057_s0 + $0x330] sm:$0xff]  ;;  %v3177_v45 = vld [vmem:[%s6057_s0 + $0x338] sm:$0xff] }
 0x11e   :  { %v482_v63 = vadd.f32 %v481_v62, %v4769_v53  ;;  %v483_v1 = vpop.f32.mrb[3].mxu1  ;;  %v395_v2 = vadd.f32 %v394_v0, %v4769_v53  ;;  %v3138_v62 = vld [vmem:[%s6057_s0 + $0x200] sm:$0xff]  ;;  %v3171_v0 = vld [vmem:[%s6057_s0 + $0x308] sm:$0xff] }
 0x11f   :  { %v484_v3 = vadd.f32 %v483_v1, %v4769_v53  ;;  %v502_v7 = vmax.f32 %v393_v58, 0.0  ;;  %v3139_v58 = vld [vmem:[%s6057_s0 + $0x208] sm:$0xff]  ;;  %v3156_v1 = vld [vmem:[%s6057_s0 + $0x290] sm:$0xff] }
 0x120   :  { %v504_v8 = vmax.f32 %v482_v63, 0.0  ;;  %v503_v11 = vmax.f32 %v395_v2, 0.0  ;;  %v398_v13 = vpop.f32.mrb[4].mxu0  ;;  %v3170_v63 = vld [vmem:[%s6057_s0 + $0x300] sm:$0xff]  ;;  %v3157_v2 = vld [vmem:[%s6057_s0 + $0x298] sm:$0xff] }
 0x121   :  { %v505_v12 = vmax.f32 %v484_v3, 0.0  ;;  %v487_v14 = vpop.f32.mrb[4].mxu1  ;;  %v3988_v15 = vpack.c.bf16 %v502_v7, %v498_v5  ;;  %v400_v17 = vpop.f32.mrb[5].mxu0  ;;  %v399_v21 = vadd.f32 %v398_v13, %v4773_v59  ;;  %v3188_v3 = vld [vmem:[%s6057_s0 + $0x390] sm:$0xff]  ;;  %v3189_v5 = vld [vmem:[%s6057_s0 + $0x398] sm:$0xff]  ;;  %v4005_v7 = vpack.c.bf16 %v3139_v58, %v3138_v62  ;;  %v3178_v62 = vld [vmem:[%s6057_s0 + $0x340] sm:$0xff] }
 0x122   :  { %v3996_v16 = vpack.c.bf16 %v504_v8, %v500_v6  ;;  %v489_v18 = vpop.f32.mrb[5].mxu1  ;;  %v3986_v19 = vpack.c.bf16 %v503_v11, %v499_v9  ;;  %v488_v22 = vadd.f32 %v487_v14, %v4773_v59  ;;  %v401_v24 = vadd.f32 %v400_v17, %v4773_v59  ;;  %v4845_v6 = vld [vmem:[%s6059_s2 + $0x8] sm:$0xff]  ;;  %v4856_v11 = vld [vmem:[%s6059_s2 + $0x10] sm:$0xff]  ;;  %v3141_v13 = vld [vmem:[%s6057_s0 + $0x218] sm:$0xff] }
 0x123   :  { %v3994_v20 = vpack.c.bf16 %v505_v12, %v501_v10  ;;  %v490_v25 = vadd.f32 %v489_v18, %v4773_v59  ;;  %v506_v36 = vmax.f32 %v399_v21, 0.0  ;;  %v4053_v8 = vpack.c.bf16 %v3171_v0, %v3170_v63  ;;  %v3140_v12 = vld [vmem:[%s6057_s0 + $0x210] sm:$0xff]  ;;  %v3159_v17 = vld [vmem:[%s6057_s0 + $0x2a8] sm:$0xff]  ;;  %v3190_v18 = vld [vmem:[%s6057_s0 + $0x3a0] sm:$0xff] }
 0x124   :  { %v404_v26 = vpop.f32.mrb[6].mxu0  ;;  %3987 = vmatprep.subr.bf16.mxu0 %v3986_v19  ;;  %v508_v37 = vmax.f32 %v488_v22, 0.0  ;;  %v507_v46 = vmax.f32 %v401_v24, 0.0  ;;  %v4008_v9 = vpack.c.bf16 %v3157_v2, %v3156_v1  ;;  %v4056_v10 = vpack.c.bf16 %v3189_v5, %v3188_v3  ;;  %v3172_v14 = vld [vmem:[%s6057_s0 + $0x310] sm:$0xff]  ;;  %v3191_v19 = vld [vmem:[%s6057_s0 + $0x3a8] sm:$0xff]  ;;  %v3165_v0 = vld [vmem:[%s6057_s0 + $0x2d8] sm:$0xff] }
 0x125   :  { %v493_v27 = vpop.f32.mrb[6].mxu1  ;;  %3995 = vmatprep.subr.bf16.mxu1 %v3994_v20  ;;  %v405_v28 = vadd.f32 %v404_v26, %v4783_v23  ;;  %v406_v30 = vpop.f32.mrb[7].mxu0  ;;  %3989 = vmatpush1.bf16.msra.mxu0 %v3988_v15  ;;  %v509_v47 = vmax.f32 %v490_v25, 0.0  ;;  %v3173_v15 = vld [vmem:[%s6057_s0 + $0x318] sm:$0xff]  ;;  %v4011_v21 = vpack.c.bf16 %v3141_v13, %v3140_v12  ;;  %v4062_v25 = vpack.c.bf16 %v3191_v19, %v3190_v18  ;;  %v3142_v26 = vld [vmem:[%s6057_s0 + $0x220] sm:$0xff]  ;;  %v3179_v58 = vld [vmem:[%s6057_s0 + $0x348] sm:$0xff] }
 0x126   :  { %v494_v29 = vadd.f32 %v493_v27, %v4783_v23  ;;  %v495_v31 = vpop.f32.mrb[7].mxu1  ;;  %3997 = vmatpush1.bf16.msra.mxu1 %v3996_v16  ;;  %v407_v32 = vadd.f32 %v406_v30, %v4783_v23  ;;  %v3158_v16 = vld [vmem:[%s6057_s0 + $0x2a0] sm:$0xff]  ;;  %v4899_v20 = vld [vmem:[%s6059_s2 + $0x18] sm:$0xff]  ;;  %v4059_v22 = vpack.c.bf16 %v3173_v15, %v3172_v14  ;;  %v3143_v27 = vld [vmem:[%s6057_s0 + $0x228] sm:$0xff]  ;;  %v4077_v5 = vpack.c.bf16 %v3179_v58, %v3178_v62 }
 0x127   :  { %v496_v33 = vadd.f32 %v495_v31, %v4783_v23  ;;  %v510_v38 = vmax.f32 %v405_v28, 0.0  ;;  %v4014_v24 = vpack.c.bf16 %v3159_v17, %v3158_v16  ;;  %v3174_v28 = vld [vmem:[%s6057_s0 + $0x320] sm:$0xff]  ;;  %v3160_v30 = vld [vmem:[%s6057_s0 + $0x2b0] sm:$0xff]  ;;  %v3161_v31 = vld [vmem:[%s6057_s0 + $0x2b8] sm:$0xff]  ;;  %v4017_v34 = vpack.c.bf16 %v3143_v27, %v3142_v26 }
 0x128   :  { %v512_v39 = vmax.f32 %v494_v29, 0.0  ;;  %v511_v50 = vmax.f32 %v407_v32, 0.0  ;;  %v3175_v29 = vld [vmem:[%s6057_s0 + $0x328] sm:$0xff]  ;;  %v3192_v32 = vld [vmem:[%s6057_s0 + $0x3b0] sm:$0xff]  ;;  %v3197_v2 = vld [vmem:[%s6057_s0 + $0x3d8] sm:$0xff] }
 0x129   :  { %v513_v51 = vmax.f32 %v496_v33, 0.0  ;;  %v3992_v52 = vpack.c.bf16 %v510_v38, %v506_v36  ;;  %v3193_v33 = vld [vmem:[%s6057_s0 + $0x3b8] sm:$0xff]  ;;  %v4065_v35 = vpack.c.bf16 %v3175_v29, %v3174_v28  ;;  %v4020_v36 = vpack.c.bf16 %v3161_v31, %v3160_v30  ;;  %v3144_v38 = vld [vmem:[%s6057_s0 + $0x230] sm:$0xff]  ;;  %v3166_v14 = vld [vmem:[%s6057_s0 + $0x2e0] sm:$0xff] }
 0x12a   :  { %v4000_v55 = vpack.c.bf16 %v512_v39, %v508_v37  ;;  %v3990_v56 = vpack.c.bf16 %v511_v50, %v507_v46  ;;  %v4068_v37 = vpack.c.bf16 %v3193_v33, %v3192_v32  ;;  %v3145_v39 = vld [vmem:[%s6057_s0 + $0x238] sm:$0xff]  ;;  %v3162_v46 = vld [vmem:[%s6057_s0 + $0x2c0] sm:$0xff]  ;;  %v3164_v63 = vld [vmem:[%s6057_s0 + $0x2d0] sm:$0xff] }
 0x12b   :  { %v3998_v57 = vpack.c.bf16 %v513_v51, %v509_v47  ;;  %v3163_v47 = vld [vmem:[%s6057_s0 + $0x2c8] sm:$0xff]  ;;  %v3194_v50 = vld [vmem:[%s6057_s0 + $0x3c0] sm:$0xff]  ;;  %v3196_v1 = vld [vmem:[%s6057_s0 + $0x3d0] sm:$0xff] }
 0x12c   :  { %3991 = vmatprep.subr.bf16.mxu0 %v3990_v56  ;;  %v3195_v51 = vld [vmem:[%s6057_s0 + $0x3c8] sm:$0xff]  ;;  %v4026_v56 = vpack.c.bf16 %v3163_v47, %v3162_v46  ;;  %v3180_v12 = vld [vmem:[%s6057_s0 + $0x350] sm:$0xff]  ;;  %v3181_v13 = vld [vmem:[%s6057_s0 + $0x358] sm:$0xff] }
 0x12d   :  { %3999 = vmatprep.subr.bf16.mxu1 %v3998_v57  ;;  %3993 = vmatpush1.bf16.msra.mxu0 %v3992_v52  ;;  %v4023_v52 = vpack.c.bf16 %v3145_v39, %v3144_v38  ;;  %v4074_v57 = vpack.c.bf16 %v3195_v51, %v3194_v50  ;;  %v3167_v15 = vld [vmem:[%s6057_s0 + $0x2e8] sm:$0xff]  ;;  %v3198_v16 = vld [vmem:[%s6057_s0 + $0x3e0] sm:$0xff]  ;;  %v4083_v19 = vpack.c.bf16 %v3181_v13, %v3180_v12  ;;  %v3168_v28 = vld [vmem:[%s6057_s0 + $0x2f0] sm:$0xff] }
 0x12e   :  { %4001 = vmatpush1.bf16.msra.mxu1 %v4000_v55  ;;  %4004 = vmatprep.subr.msk.bf16.mxu0 %vm4427_vm1, %v4002_v54  ;;  %v4071_v55 = vpack.c.bf16 %v3177_v45, %v3176_v44  ;;  %v3146_v54 = vld [vmem:[%s6057_s0 + $0x240] sm:$0xff]  ;;  %v3199_v17 = vld [vmem:[%s6057_s0 + $0x3e8] sm:$0xff]  ;;  %v3169_v29 = vld [vmem:[%s6057_s0 + $0x2f8] sm:$0xff] }
 0x12f   :  { %4052 = vmatprep.subr.msk.bf16.mxu1 %vm4427_vm1, %v4050_v60  ;;  %v3147_v60 = vld [vmem:[%s6057_s0 + $0x248] sm:$0xff]  ;;  %v3182_v26 = vld [vmem:[%s6057_s0 + $0x360] sm:$0xff]  ;;  %v3200_v30 = vld [vmem:[%s6057_s0 + $0x3f0] sm:$0xff] }
 0x130   :  { %3130 = vmatmul.mubr.msk.f32.vlgmr.msra.gmra.mrb[8].mxu0 %vm530_vm2, %v4806_v61  ;;  %v4029_v3 = vpack.c.bf16 %v3147_v60, %v3146_v54  ;;  %v3183_v27 = vld [vmem:[%s6057_s0 + $0x368] sm:$0xff]  ;;  %v3201_v31 = vld [vmem:[%s6057_s0 + $0x3f8] sm:$0xff]  ;;  %v3184_v38 = vld [vmem:[%s6057_s0 + $0x370] sm:$0xff] }
 0x131   :  { %3134 = vmatmul.mubr.msk.f32.vlgmr.msra.gmra.mrb[8].mxu1 %vm530_vm2, %v4806_v61  ;;  %613 = vmatprep.mubr.f32.mxu0 %v4385_v43  ;;  %v4089_v33 = vpack.c.bf16 %v3183_v27, %v3182_v26  ;;  %v3185_v39 = vld [vmem:[%s6057_s0 + $0x378] sm:$0xff] }
 0x132   :  { %702 = vmatprep.mubr.f32.mxu1 %v4385_v43  ;;  %v4095_v45 = vpack.c.bf16 %v3185_v39, %v3184_v38 }
 0x134   :  { %3131 = vmatmul.mubr.msk.f32.gmra.mrb[10].mxu0 %vm530_vm2, %v4845_v6 }
 0x135   :  { %3135 = vmatmul.mubr.msk.f32.gmra.mrb[10].mxu1 %vm530_vm2, %v4845_v6  ;;  %619 = vmatprep.mubr.f32.mxu0 %v4385_v43 }
 0x136   :  { %708 = vmatprep.mubr.f32.mxu1 %v4385_v43  ;;  %4007 = vmatpush3.bf16.xpose.msk.msra.mxu0 %vm4427_vm1, %v4005_v7  ;;  %v4032_v7 = vpack.c.bf16 %v3165_v0, %v3164_v63 }
 0x137   :  { %4055 = vmatpush3.bf16.xpose.msk.msra.mxu1 %vm4427_vm1, %v4053_v8  ;;  %4010 = vmatprep.subr.msk.bf16.mxu0 %vm4427_vm1, %v4008_v9  ;;  %v4080_v8 = vpack.c.bf16 %v3197_v2, %v3196_v1  ;;  %v3148_v9 = vld [vmem:[%s6057_s0 + $0x250] sm:$0xff] }
 0x138   :  { %4058 = vmatprep.subr.msk.bf16.mxu1 %vm4427_vm1, %v4056_v10  ;;  %3132 = vmatmul.mubr.msk.f32.gmra.mrb[12].mxu0 %vm530_vm2, %v4856_v11  ;;  %v3149_v10 = vld [vmem:[%s6057_s0 + $0x258] sm:$0xff] }
 0x139   :  { %3136 = vmatmul.mubr.msk.f32.gmra.mrb[12].mxu1 %vm530_vm2, %v4856_v11  ;;  %625 = vmatprep.mubr.f32.mxu0 %v4385_v43  ;;  %v4035_v18 = vpack.c.bf16 %v3149_v10, %v3148_v9 }
 0x13a   :  { %714 = vmatprep.mubr.f32.mxu1 %v4385_v43 }
 0x13c   :  { %3133 = vmatmul.mubr.msk.f32.gmra.mrb[14].mxu0 %vm530_vm2, %v4899_v20 }
 0x13d   :  { %3137 = vmatmul.mubr.msk.f32.gmra.mrb[14].mxu1 %vm530_vm2, %v4899_v20  ;;  %3682 = vmatprep.mubr.msk.f32.mxu0 %vm115_vm0, %v4545_v48 }
 0x13e   :  { %3722 = vmatprep.mubr.msk.f32.mxu1 %vm115_vm0, %v4545_v48  ;;  %4013 = vmatpush3.bf16.xpose.msk.msra.mxu0 %vm4427_vm1, %v4011_v21  ;;  %v4038_v21 = vpack.c.bf16 %v3167_v15, %v3166_v14 }
 0x13f   :  { %4061 = vmatpush3.bf16.xpose.msk.msra.mxu1 %vm4427_vm1, %v4059_v22  ;;  %4016 = vmatprep.subr.msk.bf16.mxu0 %vm4427_vm1, %v4014_v24  ;;  %v4086_v22 = vpack.c.bf16 %v3199_v17, %v3198_v16  ;;  %v3150_v24 = vld [vmem:[%s6057_s0 + $0x260] sm:$0xff] }
 0x140   :  { %4064 = vmatprep.subr.msk.bf16.mxu1 %vm4427_vm1, %v4062_v25  ;;  %v3151_v25 = vld [vmem:[%s6057_s0 + $0x268] sm:$0xff] }
 0x141   :  { %v4041_v32 = vpack.c.bf16 %v3151_v25, %v3150_v24 }
 0x146   :  { %4019 = vmatpush3.bf16.xpose.msk.msra.mxu0 %vm4427_vm1, %v4017_v34  ;;  %v4044_v34 = vpack.c.bf16 %v3169_v29, %v3168_v28 }
 0x147   :  { %4067 = vmatpush3.bf16.xpose.msk.msra.mxu1 %vm4427_vm1, %v4065_v35  ;;  %4022 = vmatprep.subr.msk.bf16.mxu0 %vm4427_vm1, %v4020_v36  ;;  %v4092_v35 = vpack.c.bf16 %v3201_v31, %v3200_v30  ;;  %v3152_v36 = vld [vmem:[%s6057_s0 + $0x270] sm:$0xff] }
 0x148   :  { %4070 = vmatprep.subr.msk.bf16.mxu1 %vm4427_vm1, %v4068_v37  ;;  %v3153_v37 = vld [vmem:[%s6057_s0 + $0x278] sm:$0xff] }
 0x149   :  { %v4047_v44 = vpack.c.bf16 %v3153_v37, %v3152_v36 }
 0x14e   :  { %4025 = vmatpush3.bf16.xpose.msk.msra.mxu0 %vm4427_vm1, %v4023_v52 }
 0x14f   :  { %4073 = vmatpush3.bf16.xpose.msk.msra.mxu1 %vm4427_vm1, %v4071_v55  ;;  %4028 = vmatprep.subr.msk.bf16.mxu0 %vm4427_vm1, %v4026_v56 }
 0x150   :  { %4076 = vmatprep.subr.msk.bf16.mxu1 %vm4427_vm1, %v4074_v57 }
 0x156   :  { %4031 = vmatpush3.bf16.xpose.msk.msra.mxu0 %vm4427_vm1, %v4029_v3 }
 0x157   :  { %4079 = vmatpush3.bf16.xpose.msk.msra.mxu1 %vm4427_vm1, %v4077_v5  ;;  %4034 = vmatprep.subr.msk.bf16.mxu0 %vm4427_vm1, %v4032_v7 }
 0x158   :  { %4082 = vmatprep.subr.msk.bf16.mxu1 %vm4427_vm1, %v4080_v8 }
 0x15e   :  { %4037 = vmatpush3.bf16.xpose.msk.msra.mxu0 %vm4427_vm1, %v4035_v18 }
 0x15f   :  { %4085 = vmatpush3.bf16.xpose.msk.msra.mxu1 %vm4427_vm1, %v4083_v19  ;;  %4040 = vmatprep.subr.msk.bf16.mxu0 %vm4427_vm1, %v4038_v21 }
 0x160   :  { %4088 = vmatprep.subr.msk.bf16.mxu1 %vm4427_vm1, %v4086_v22 }
 0x166   :  { %4043 = vmatpush3.bf16.xpose.msk.msra.mxu0 %vm4427_vm1, %v4041_v32 }
 0x167   :  { %4091 = vmatpush3.bf16.xpose.msk.msra.mxu1 %vm4427_vm1, %v4089_v33  ;;  %4046 = vmatprep.subr.msk.bf16.mxu0 %vm4427_vm1, %v4044_v34 }
 0x168   :  { %4094 = vmatprep.subr.msk.bf16.mxu1 %vm4427_vm1, %v4092_v35 }
 0x16e   :  { %4049 = vmatpush3.bf16.xpose.msk.msra.mxu0 %vm4427_vm1, %v4047_v44 }
 0x16f   :  { %4097 = vmatpush3.bf16.xpose.msk.msra.mxu1 %vm4427_vm1, %v4095_v45 }
 0x175   :  { %3683 = vmatmul.mubr.msk.f32.vlgmr.msra.gmra.mrb[16].mxu0 %vm115_vm0, %v4545_v48 }
 0x176   :  { %3723 = vmatmul.mubr.msk.f32.vlgmr.msra.gmra.mrb[16].mxu1 %vm115_vm0, %v4545_v48  ;;  %3684 = vmatprep.mubr.msk.f32.mxu0 %vm115_vm0, %v4714_v40  ;;  %v5123_v48 = vpop.permute.xlu1 %519 }
 0x177   :  { %3724 = vmatprep.mubr.msk.f32.mxu1 %vm115_vm0, %v4714_v40 }
 0x179   :  { %3685 = vmatmul.mubr.msk.f32.gmra.mrb[18].mxu0 %vm115_vm0, %v4714_v40 }
 0x17a   :  { %3725 = vmatmul.mubr.msk.f32.gmra.mrb[18].mxu1 %vm115_vm0, %v4714_v40  ;;  %3686 = vmatprep.mubr.msk.f32.mxu0 %vm115_vm0, %v4727_v41  ;;  %v5125_v40 = vpop.permute.xlu0 %515 }
 0x17b   :  { %3726 = vmatprep.mubr.msk.f32.mxu1 %vm115_vm0, %v4727_v41 }
 0x17d   :  { %3687 = vmatmul.mubr.msk.f32.gmra.mrb[20].mxu0 %vm115_vm0, %v4727_v41 }
 0x17e   :  { %3727 = vmatmul.mubr.msk.f32.gmra.mrb[20].mxu1 %vm115_vm0, %v4727_v41  ;;  %3688 = vmatprep.mubr.msk.f32.mxu0 %vm115_vm0, %v4740_v42  ;;  %v5127_v41 = vpop.permute.xlu1 %523  ;;  %v5129_v46 = vpop.permute.xlu0 %527 }
 0x17f   :  { %3728 = vmatprep.mubr.msk.f32.mxu1 %vm115_vm0, %v4740_v42 }
 0x181   :  { %3689 = vmatmul.mubr.msk.f32.gmra.mrb[22].mxu0 %vm115_vm0, %v4740_v42 }
 0x182   :  { %3729 = vmatmul.mubr.msk.f32.gmra.mrb[22].mxu1 %vm115_vm0, %v4740_v42  ;;  %1363 = vmatprep.mubr.f32.mxu0 %v4385_v43  ;;  %v5131_v47 = vpop.permute.xlu1 %738  ;;  %v5141_v8 = vpop.permute.xlu0 %742 }
 0x183   :  { %1452 = vmatprep.mubr.f32.mxu1 %v4385_v43 }
 0x186   :  { %v5143_v12 = vpop.permute.xlu1 %746 }
 0x203   :  { %v609_v50 = vpop.f32.mrb[8].mxu0 }
 0x204   :  { %v698_v51 = vpop.f32.mrb[8].mxu1  ;;  %v610_v52 = vadd.f32 %v609_v50, %v5125_v40  ;;  %v611_v55 = vpop.f32.mrb[9].mxu0 }
 0x205   :  { %v700_v42 = vpop.f32.mrb[9].mxu1  ;;  %v612_v56 = vadd.f32 %v611_v55, %v5125_v40  ;;  %v699_v54 = vadd.f32 %v698_v51, %v5125_v40 }
 0x206   :  { %v721_v57 = vmax.f32 %v610_v52, 0.0  ;;  %v701_v62 = vadd.f32 %v700_v42, %v5125_v40 }
 0x207   :  { %v722_v60 = vmax.f32 %v612_v56, 0.0  ;;  %v615_v58 = vpop.f32.mrb[10].mxu0  ;;  %v723_v9 = vmax.f32 %v699_v54, 0.0  ;;  %v5161_v54 = vpop.permute.xlu1 %750 }
 0x208   :  { %v704_v63 = vpop.f32.mrb[10].mxu1  ;;  %v616_v0 = vadd.f32 %v615_v58, %v5123_v48  ;;  %v617_v2 = vpop.f32.mrb[11].mxu0  ;;  %v753_v13 = vmul.f32 %v5131_v47, %v721_v57  ;;  %v724_v14 = vmax.f32 %v701_v62, 0.0 }
 0x209   :  { %v705_v1 = vadd.f32 %v704_v63, %v5123_v48  ;;  %v706_v3 = vpop.f32.mrb[11].mxu1  ;;  %v618_v5 = vadd.f32 %v617_v2, %v5123_v48  ;;  %v754_v18 = vmul.f32 %v5131_v47, %v722_v60  ;;  %v755_v33 = vmul.f32 %v5131_v47, %v723_v9 }
 0x20a   :  { %v707_v7 = vadd.f32 %v706_v3, %v5123_v48  ;;  %v725_v10 = vmax.f32 %v616_v0, 0.0  ;;  %v756_v39 = vmul.f32 %v5131_v47, %v724_v14 }
 0x20b   :  { %v726_v15 = vmax.f32 %v618_v5, 0.0  ;;  %v621_v16 = vpop.f32.mrb[12].mxu0  ;;  %v727_v19 = vmax.f32 %v705_v1, 0.0 }
 0x20c   :  { %v710_v17 = vpop.f32.mrb[12].mxu1  ;;  %v622_v21 = vadd.f32 %v621_v16, %v5127_v41  ;;  %v623_v24 = vpop.f32.mrb[13].mxu0  ;;  %v757_v26 = vmul.f32 %v5141_v8, %v725_v10  ;;  %v728_v27 = vmax.f32 %v707_v7, 0.0 }
 0x20d   :  { %v711_v22 = vadd.f32 %v710_v17, %v5127_v41  ;;  %v712_v25 = vpop.f32.mrb[13].mxu1  ;;  %v624_v28 = vadd.f32 %v623_v24, %v5127_v41  ;;  %v758_v30 = vmul.f32 %v5141_v8, %v726_v15  ;;  %v759_v55 = vmul.f32 %v5141_v8, %v727_v19 }
 0x20e   :  { %v713_v29 = vadd.f32 %v712_v25, %v5127_v41  ;;  %v729_v31 = vmax.f32 %v622_v21, 0.0  ;;  %v769_v34 = vadd.f32 %v757_v26, %v753_v13  ;;  %v760_v60 = vmul.f32 %v5141_v8, %v728_v27 }
 0x20f   :  { %v731_v32 = vmax.f32 %v711_v22, 0.0  ;;  %v730_v35 = vmax.f32 %v624_v28, 0.0  ;;  %v627_v37 = vpop.f32.mrb[14].mxu0  ;;  %v778_v44 = vadd.f32 %v758_v30, %v754_v18  ;;  %v787_v13 = vadd.f32 %v759_v55, %v755_v33 }
 0x210   :  { %v732_v36 = vmax.f32 %v713_v29, 0.0  ;;  %v716_v38 = vpop.f32.mrb[14].mxu1  ;;  %v628_v45 = vadd.f32 %v627_v37, %v5129_v46  ;;  %v629_v51 = vpop.f32.mrb[15].mxu0  ;;  %v761_v42 = vmul.f32 %v5143_v12, %v729_v31  ;;  %v796_v16 = vadd.f32 %v760_v60, %v756_v39 }
 0x211   :  { %v717_v50 = vadd.f32 %v716_v38, %v5129_v46  ;;  %v718_v52 = vpop.f32.mrb[15].mxu1  ;;  %v630_v56 = vadd.f32 %v629_v51, %v5129_v46  ;;  %v762_v62 = vmul.f32 %v5143_v12, %v730_v35  ;;  %v763_v0 = vmul.f32 %v5143_v12, %v731_v32 }
 0x212   :  { %v719_v57 = vadd.f32 %v718_v52, %v5129_v46  ;;  %v733_v58 = vmax.f32 %v628_v45, 0.0  ;;  %v764_v1 = vmul.f32 %v5143_v12, %v732_v36  ;;  %v770_v5 = vadd.f32 %v769_v34, %v761_v42  ;;  %v5171_v52 = vpop.permute.xlu0 %807 }
 0x213   :  { %v735_v63 = vmax.f32 %v717_v50, 0.0  ;;  %v734_v2 = vmax.f32 %v630_v56, 0.0  ;;  %v779_v7 = vadd.f32 %v778_v44, %v762_v62  ;;  %v788_v18 = vadd.f32 %v787_v13, %v763_v0 }
 0x214   :  { %v736_v3 = vmax.f32 %v719_v57, 0.0  ;;  %v765_v9 = vmul.f32 %v5161_v54, %v733_v58  ;;  %v797_v21 = vadd.f32 %v796_v16, %v764_v1  ;;  %v4389_v35 = vmov 1966171168  }
 0x215   :  { %v767_v10 = vmul.f32 %v5161_v54, %v735_v63  ;;  %v766_v14 = vmul.f32 %v5161_v54, %v734_v2  ;;  %v821_v36 = vunpack.c.l.s4 %v4389_v35  ;;  %v823_v37 = vlaneseq }
 0x216   :  { %v768_v15 = vmul.f32 %v5161_v54, %v736_v3  ;;  %v771_v17 = vadd.f32 %v770_v5, %v765_v9 }
 0x217   :  { %v780_v19 = vadd.f32 %v779_v7, %v766_v14  ;;  %v789_v24 = vadd.f32 %v788_v18, %v767_v10  ;;  %v822_v56 = vunpack.c.0.s8 %v821_v36  ;;  %v824_v57 = vshrl.u32 %v823_v37, 7 }
 0x218   :  { %v772_v22 = vrot.slane %v771_v17, 4  ;;  %v798_v26 = vadd.f32 %v797_v21, %v768_v15  ;;  %vm5181_vm3 = vcmp.lt.s32.totalorder %v823_v37, 512 }
 0x219   :  { %v781_v25 = vrot.slane %v780_v19, 4  ;;  %v790_v28 = vrot.slane %v789_v24, 4  ;;  %v5175_v5 = vsub.s32 %v822_v56, %v824_v57 }
 0x21a   :  { %v773_v27 = vadd.f32 %v772_v22, %v771_v17  ;;  %v799_v30 = vrot.slane %v798_v26, 4 }
 0x21b   :  { %v782_v29 = vadd.f32 %v781_v25, %v780_v19  ;;  %v791_v32 = vadd.f32 %v790_v28, %v789_v24 }
 0x21c   :  { %v774_v31 = vrot.slane %v773_v27, 2  ;;  %v800_v34 = vadd.f32 %v799_v30, %v798_v26 }
 0x21d   :  { %v783_v33 = vrot.slane %v782_v29, 2  ;;  %v792_v39 = vrot.slane %v791_v32, 2 }
 0x21e   :  { %v775_v38 = vadd.f32 %v774_v31, %v773_v27  ;;  %v801_v45 = vrot.slane %v800_v34, 2 }
 0x21f   :  { %v784_v44 = vadd.f32 %v783_v33, %v782_v29  ;;  %v793_v51 = vadd.f32 %v792_v39, %v791_v32 }
 0x220   :  { %v776_v50 = vrot.slane %v775_v38, 1  ;;  %v802_v42 = vadd.f32 %v801_v45, %v800_v34 }
 0x221   :  { %v785_v55 = vrot.slane %v784_v44, 1  ;;  %v794_v62 = vrot.slane %v793_v51, 1 }
 0x222   :  { %v777_v60 = vadd.f32 %v776_v50, %v775_v38  ;;  %v803_v63 = vrot.slane %v802_v42, 1 }
 0x223   :  { %v786_v58 = vadd.f32 %v785_v55, %v784_v44  ;;  %v795_v0 = vadd.f32 %v794_v62, %v793_v51 }
 0x224   :  { %v810_v1 = vadd.f32 %v5171_v52, %v777_v60  ;;  %v804_v2 = vadd.f32 %v803_v63, %v802_v42 }
 0x225   :  { %v811_v3 = vadd.f32 %v5171_v52, %v786_v58  ;;  %v812_v7 = vadd.f32 %v5171_v52, %v795_v0 }
 0x226   :  { %v813_v9 = vadd.f32 %v5171_v52, %v804_v2 }
 0x227   :  { %v818_v10 = vcombine.low %v810_v1, %v811_v3 }
 0x228   :  { %v819_v13 = vcombine.low %v812_v7, %v813_v9 }
 0x229   :  { %v826_v14 = vrot.slane %v818_v10, %v5175_v5 }
 0x22a   :  { %v833_v15 = vrot.slane %v819_v13, %v5175_v5 }
 0x22c   :  { %v834_v16 = vcombine.low %v826_v14, %v833_v15 }
 0x22e   :  { %v841_v18 = vrot.slane %v834_v16, %v5175_v5 }
 0x230   :  { %847 = vst.msk [vmem:[#allocation2] sm:$0xf] %vm5181_vm3, %v841_v18 }
 0x248   :  { %v1171_v19 = vpop.f32.mrb[16].mxu0 }
 0x249   :  { %v1260_v21 = vpop.f32.mrb[16].mxu1  ;;  %v1173_v22 = vpop.f32.mrb[17].mxu0  ;;  %v1172_v25 = vadd.f32 %v1171_v19, %v4766_v49 }
 0x24a   :  { %v1262_v24 = vpop.f32.mrb[17].mxu1  ;;  %v1261_v26 = vadd.f32 %v1260_v21, %v4766_v49  ;;  %v1174_v27 = vadd.f32 %v1173_v22, %v4766_v49  ;;  %v3298_v21 = vld [vmem:[%s6057_s0 + $0x480] sm:$0xff]  ;;  %v3299_v22 = vld [vmem:[%s6057_s0 + $0x488] sm:$0xff] }
 0x24b   :  { %v1263_v28 = vadd.f32 %v1262_v24, %v4766_v49  ;;  %v1283_v37 = vmax.f32 %v1172_v25, 0.0 }
 0x24c   :  { %v1177_v29 = vpop.f32.mrb[18].mxu0  ;;  %v1285_v38 = vmax.f32 %v1261_v26, 0.0  ;;  %v1284_v45 = vmax.f32 %v1174_v27, 0.0 }
 0x24d   :  { %v1266_v30 = vpop.f32.mrb[18].mxu1  ;;  %v1178_v31 = vadd.f32 %v1177_v29, %v4769_v53  ;;  %v1179_v33 = vpop.f32.mrb[19].mxu0  ;;  %v1286_v50 = vmax.f32 %v1263_v28, 0.0  ;;  %v3330_v28 = vld [vmem:[%s6057_s0 + $0x580] sm:$0xff]  ;;  %v3331_v29 = vld [vmem:[%s6057_s0 + $0x588] sm:$0xff] }
 0x24e   :  { %v1267_v32 = vadd.f32 %v1266_v30, %v4769_v53  ;;  %v1268_v34 = vpop.f32.mrb[19].mxu1  ;;  %v1180_v35 = vadd.f32 %v1179_v33, %v4769_v53 }
 0x24f   :  { %v1269_v36 = vadd.f32 %v1268_v34, %v4769_v53  ;;  %v1287_v39 = vmax.f32 %v1178_v31, 0.0 }
 0x250   :  { %v1289_v44 = vmax.f32 %v1267_v32, 0.0  ;;  %v1288_v51 = vmax.f32 %v1180_v35, 0.0  ;;  %v1183_v42 = vpop.f32.mrb[20].mxu0 }
 0x251   :  { %v1290_v55 = vmax.f32 %v1269_v36, 0.0  ;;  %v1272_v56 = vpop.f32.mrb[20].mxu1  ;;  %v4100_v57 = vpack.c.bf16 %v1287_v39, %v1283_v37  ;;  %v1185_v62 = vpop.f32.mrb[21].mxu0  ;;  %v1184_v1 = vadd.f32 %v1183_v42, %v4773_v59  ;;  %v4162_v39 = vpack.c.bf16 %v3331_v29, %v3330_v28  ;;  %v3301_v42 = vld [vmem:[%s6057_s0 + $0x498] sm:$0xff] }
 0x252   :  { %v4108_v60 = vpack.c.bf16 %v1289_v44, %v1285_v38  ;;  %v1274_v58 = vpop.f32.mrb[21].mxu1  ;;  %v4098_v63 = vpack.c.bf16 %v1288_v51, %v1284_v45  ;;  %v1273_v2 = vadd.f32 %v1272_v56, %v4773_v59  ;;  %v1186_v3 = vadd.f32 %v1185_v62, %v4773_v59  ;;  %v3282_v44 = vld [vmem:[%s6057_s0 + $0x400] sm:$0xff]  ;;  %v3283_v45 = vld [vmem:[%s6057_s0 + $0x408] sm:$0xff]  ;;  %v3332_v56 = vld [vmem:[%s6057_s0 + $0x590] sm:$0xff] }
 0x253   :  { %v4106_v0 = vpack.c.bf16 %v1290_v55, %v1286_v50  ;;  %v1275_v7 = vadd.f32 %v1274_v58, %v4773_v59  ;;  %v1291_v24 = vmax.f32 %v1184_v1, 0.0  ;;  %v4114_v38 = vpack.c.bf16 %v3299_v22, %v3298_v21  ;;  %v3314_v50 = vld [vmem:[%s6057_s0 + $0x500] sm:$0xff]  ;;  %v3315_v51 = vld [vmem:[%s6057_s0 + $0x508] sm:$0xff]  ;;  %v3300_v55 = vld [vmem:[%s6057_s0 + $0x490] sm:$0xff] }
 0x254   :  { %v1189_v9 = vpop.f32.mrb[22].mxu0  ;;  %4099 = vmatprep.subr.bf16.mxu0 %v4098_v63  ;;  %v1293_v25 = vmax.f32 %v1273_v2, 0.0  ;;  %v1292_v30 = vmax.f32 %v1186_v3, 0.0  ;;  %v4165_v62 = vpack.c.bf16 %v3315_v51, %v3314_v50  ;;  %v4120_v58 = vpack.c.bf16 %v3301_v42, %v3300_v55  ;;  %v3284_v63 = vld [vmem:[%s6057_s0 + $0x410] sm:$0xff]  ;;  %v3317_v1 = vld [vmem:[%s6057_s0 + $0x518] sm:$0xff]  ;;  %v3302_v2 = vld [vmem:[%s6057_s0 + $0x4a0] sm:$0xff] }
 0x255   :  { %v1278_v10 = vpop.f32.mrb[22].mxu1  ;;  %4107 = vmatprep.subr.bf16.mxu1 %v4106_v0  ;;  %v1190_v13 = vadd.f32 %v1189_v9, %v4783_v23  ;;  %v1191_v15 = vpop.f32.mrb[23].mxu0  ;;  %4101 = vmatpush1.bf16.msra.mxu0 %v4100_v57  ;;  %v1294_v31 = vmax.f32 %v1275_v7, 0.0  ;;  %v3333_v57 = vld [vmem:[%s6057_s0 + $0x598] sm:$0xff]  ;;  %v3303_v3 = vld [vmem:[%s6057_s0 + $0x4a8] sm:$0xff]  ;;  %v3334_v7 = vld [vmem:[%s6057_s0 + $0x5a0] sm:$0xff] }
 0x256   :  { %v1279_v14 = vadd.f32 %v1278_v10, %v4783_v23  ;;  %v1280_v16 = vpop.f32.mrb[23].mxu1  ;;  %4109 = vmatpush1.bf16.msra.mxu1 %v4108_v60  ;;  %v1192_v18 = vadd.f32 %v1191_v15, %v4783_v23  ;;  %v4117_v60 = vpack.c.bf16 %v3283_v45, %v3282_v44  ;;  %v3285_v0 = vld [vmem:[%s6057_s0 + $0x418] sm:$0xff]  ;;  %v3335_v9 = vld [vmem:[%s6057_s0 + $0x5a8] sm:$0xff]  ;;  %v5301_v15 = vld [vmem:[%s6058_s1] sm:$0xff] }
 0x257   :  { %v1281_v19 = vadd.f32 %v1280_v16, %v4783_v23  ;;  %v1295_v26 = vmax.f32 %v1190_v13, 0.0  ;;  %v4123_v10 = vpack.c.bf16 %v3285_v0, %v3284_v63  ;;  %v3287_v16 = vld [vmem:[%s6057_s0 + $0x428] sm:$0xff]  ;;  %v3304_v21 = vld [vmem:[%s6057_s0 + $0x4b0] sm:$0xff]  ;;  %v3305_v22 = vld [vmem:[%s6057_s0 + $0x4b8] sm:$0xff] }
 0x258   :  { %v1297_v27 = vmax.f32 %v1279_v14, 0.0  ;;  %v1296_v32 = vmax.f32 %v1192_v18, 0.0  ;;  %v4126_v14 = vpack.c.bf16 %v3303_v3, %v3302_v2  ;;  %v3318_v18 = vld [vmem:[%s6057_s0 + $0x520] sm:$0xff]  ;;  %v4132_v28 = vpack.c.bf16 %v3305_v22, %v3304_v21  ;;  %v3291_v51 = vld [vmem:[%s6057_s0 + $0x448] sm:$0xff]  ;;  %v3324_v2 = vld [vmem:[%s6057_s0 + $0x550] sm:$0xff] }
 0x259   :  { %v1298_v33 = vmax.f32 %v1281_v19, 0.0  ;;  %v4104_v34 = vpack.c.bf16 %v1295_v26, %v1291_v24  ;;  %v3319_v19 = vld [vmem:[%s6057_s0 + $0x528] sm:$0xff]  ;;  %v3336_v24 = vld [vmem:[%s6057_s0 + $0x5b0] sm:$0xff]  ;;  %v3290_v50 = vld [vmem:[%s6057_s0 + $0x440] sm:$0xff] }
 0x25a   :  { %v4112_v35 = vpack.c.bf16 %v1297_v27, %v1293_v25  ;;  %v4102_v36 = vpack.c.bf16 %v1296_v32, %v1292_v30  ;;  %v3337_v25 = vld [vmem:[%s6057_s0 + $0x5b8] sm:$0xff]  ;;  %v4177_v27 = vpack.c.bf16 %v3319_v19, %v3318_v18  ;;  %v3288_v30 = vld [vmem:[%s6057_s0 + $0x430] sm:$0xff]  ;;  %v3322_v55 = vld [vmem:[%s6057_s0 + $0x540] sm:$0xff] }
 0x25b   :  { %v4110_v37 = vpack.c.bf16 %v1298_v33, %v1294_v31  ;;  %v4180_v29 = vpack.c.bf16 %v3337_v25, %v3336_v24  ;;  %v3289_v31 = vld [vmem:[%s6057_s0 + $0x438] sm:$0xff]  ;;  %v3320_v32 = vld [vmem:[%s6057_s0 + $0x530] sm:$0xff]  ;;  %v3323_v42 = vld [vmem:[%s6057_s0 + $0x548] sm:$0xff] }
 0x25c   :  { %4103 = vmatprep.subr.bf16.mxu0 %v4102_v36  ;;  %v3321_v33 = vld [vmem:[%s6057_s0 + $0x538] sm:$0xff]  ;;  %v3338_v36 = vld [vmem:[%s6057_s0 + $0x5c0] sm:$0xff]  ;;  %v3295_v19 = vld [vmem:[%s6057_s0 + $0x468] sm:$0xff] }
 0x25d   :  { %4111 = vmatprep.subr.bf16.mxu1 %v4110_v37  ;;  %4105 = vmatpush1.bf16.msra.mxu0 %v4104_v34  ;;  %v3306_v34 = vld [vmem:[%s6057_s0 + $0x4c0] sm:$0xff]  ;;  %v3339_v37 = vld [vmem:[%s6057_s0 + $0x5c8] sm:$0xff]  ;;  %v3325_v3 = vld [vmem:[%s6057_s0 + $0x558] sm:$0xff] }
 0x25e   :  { %4113 = vmatpush1.bf16.msra.mxu1 %v4112_v35  ;;  %4116 = vmatprep.subr.msk.bf16.mxu0 %vm4427_vm1, %v4114_v38  ;;  %v3307_v35 = vld [vmem:[%s6057_s0 + $0x4c8] sm:$0xff]  ;;  %v4135_v38 = vpack.c.bf16 %v3289_v31, %v3288_v30  ;;  %v4186_v45 = vpack.c.bf16 %v3339_v37, %v3338_v36  ;;  %v3294_v18 = vld [vmem:[%s6057_s0 + $0x460] sm:$0xff]  ;;  %v3312_v24 = vld [vmem:[%s6057_s0 + $0x4f0] sm:$0xff] }
 0x25f   :  { %4164 = vmatprep.subr.msk.bf16.mxu1 %vm4427_vm1, %v4162_v39  ;;  %v4183_v39 = vpack.c.bf16 %v3321_v33, %v3320_v32  ;;  %v4138_v44 = vpack.c.bf16 %v3307_v35, %v3306_v34  ;;  %v3326_v21 = vld [vmem:[%s6057_s0 + $0x560] sm:$0xff]  ;;  %v3327_v22 = vld [vmem:[%s6057_s0 + $0x568] sm:$0xff]  ;;  %v3313_v25 = vld [vmem:[%s6057_s0 + $0x4f8] sm:$0xff] }
 0x260   :  { %3274 = vmatmul.mubr.msk.f32.vlgmr.msra.gmra.mrb[24].mxu0 %vm530_vm2, %v4806_v61  ;;  %v4156_v30 = vpack.c.bf16 %v3313_v25, %v3312_v24  ;;  %v3296_v32 = vld [vmem:[%s6057_s0 + $0x470] sm:$0xff]  ;;  %v3297_v33 = vld [vmem:[%s6057_s0 + $0x478] sm:$0xff] }
 0x261   :  { %3278 = vmatmul.mubr.msk.f32.vlgmr.msra.gmra.mrb[24].mxu1 %vm530_vm2, %v4806_v61  ;;  %1369 = vmatprep.mubr.f32.mxu0 %v4385_v43  ;;  %v4168_v61 = vpack.c.bf16 %v3333_v57, %v3332_v56  ;;  %v3308_v56 = vld [vmem:[%s6057_s0 + $0x4d0] sm:$0xff]  ;;  %v3309_v57 = vld [vmem:[%s6057_s0 + $0x4d8] sm:$0xff]  ;;  %v4159_v36 = vpack.c.bf16 %v3297_v33, %v3296_v32 }
 0x262   :  { %1458 = vmatprep.mubr.f32.mxu1 %v4385_v43  ;;  %v4144_v63 = vpack.c.bf16 %v3309_v57, %v3308_v56  ;;  %v3328_v34 = vld [vmem:[%s6057_s0 + $0x570] sm:$0xff]  ;;  %v3329_v35 = vld [vmem:[%s6057_s0 + $0x578] sm:$0xff] }
 0x263   :  { %v4207_v37 = vpack.c.bf16 %v3329_v35, %v3328_v34 }
 0x264   :  { %3275 = vmatmul.mubr.msk.f32.gmra.mrb[26].mxu0 %vm530_vm2, %v4845_v6 }
 0x265   :  { %3279 = vmatmul.mubr.msk.f32.gmra.mrb[26].mxu1 %vm530_vm2, %v4845_v6  ;;  %1375 = vmatprep.mubr.f32.mxu0 %v4385_v43  ;;  %v3316_v6 = vld [vmem:[%s6057_s0 + $0x510] sm:$0xff] }
 0x266   :  { %1464 = vmatprep.mubr.f32.mxu1 %v4385_v43  ;;  %4119 = vmatpush3.bf16.xpose.msk.msra.mxu0 %vm4427_vm1, %v4117_v60  ;;  %v4171_v13 = vpack.c.bf16 %v3317_v1, %v3316_v6  ;;  %v3340_v60 = vld [vmem:[%s6057_s0 + $0x5d0] sm:$0xff]  ;;  %v3293_v1 = vld [vmem:[%s6057_s0 + $0x458] sm:$0xff] }
 0x267   :  { %4167 = vmatpush3.bf16.xpose.msk.msra.mxu1 %vm4427_vm1, %v4165_v62  ;;  %4122 = vmatprep.subr.msk.bf16.mxu0 %vm4427_vm1, %v4120_v58  ;;  %v3341_v62 = vld [vmem:[%s6057_s0 + $0x5d8] sm:$0xff]  ;;  %v4141_v58 = vpack.c.bf16 %v3291_v51, %v3290_v50  ;;  %v3292_v6 = vld [vmem:[%s6057_s0 + $0x450] sm:$0xff] }
 0x268   :  { %4170 = vmatprep.subr.msk.bf16.mxu1 %vm4427_vm1, %v4168_v61  ;;  %3276 = vmatmul.mubr.msk.f32.gmra.mrb[28].mxu0 %vm530_vm2, %v4856_v11  ;;  %v4189_v61 = vpack.c.bf16 %v3323_v42, %v3322_v55  ;;  %v4192_v0 = vpack.c.bf16 %v3341_v62, %v3340_v60 }
 0x269   :  { %3280 = vmatmul.mubr.msk.f32.gmra.mrb[28].mxu1 %vm530_vm2, %v4856_v11  ;;  %1381 = vmatprep.mubr.f32.mxu0 %v4385_v43  ;;  %v4174_v11 = vpack.c.bf16 %v3335_v9, %v3334_v7  ;;  %v3310_v7 = vld [vmem:[%s6057_s0 + $0x4e0] sm:$0xff]  ;;  %v3311_v9 = vld [vmem:[%s6057_s0 + $0x4e8] sm:$0xff] }
 0x26a   :  { %1470 = vmatprep.mubr.f32.mxu1 %v4385_v43 }
 0x26c   :  { %3277 = vmatmul.mubr.msk.f32.gmra.mrb[30].mxu0 %vm530_vm2, %v4899_v20 }
 0x26d   :  { %3281 = vmatmul.mubr.msk.f32.gmra.mrb[30].mxu1 %vm530_vm2, %v4899_v20  ;;  %3762 = vmatprep.mubr.msk.f32.mxu0 %vm115_vm0, %v5301_v15  ;;  %v3286_v20 = vld [vmem:[%s6057_s0 + $0x420] sm:$0xff] }
 0x26e   :  { %3802 = vmatprep.mubr.msk.f32.mxu1 %vm115_vm0, %v5301_v15  ;;  %4125 = vmatpush3.bf16.xpose.msk.msra.mxu0 %vm4427_vm1, %v4123_v10  ;;  %v4129_v26 = vpack.c.bf16 %v3287_v16, %v3286_v20  ;;  %v3342_v10 = vld [vmem:[%s6057_s0 + $0x5e0] sm:$0xff]  ;;  %v4150_v20 = vpack.c.bf16 %v3311_v9, %v3310_v7 }
 0x26f   :  { %4173 = vmatpush3.bf16.xpose.msk.msra.mxu1 %vm4427_vm1, %v4171_v13  ;;  %4128 = vmatprep.subr.msk.bf16.mxu0 %vm4427_vm1, %v4126_v14  ;;  %v3343_v13 = vld [vmem:[%s6057_s0 + $0x5e8] sm:$0xff]  ;;  %v4147_v14 = vpack.c.bf16 %v3293_v1, %v3292_v6 }
 0x270   :  { %4176 = vmatprep.subr.msk.bf16.mxu1 %vm4427_vm1, %v4174_v11  ;;  %v4195_v11 = vpack.c.bf16 %v3325_v3, %v3324_v2  ;;  %v4198_v16 = vpack.c.bf16 %v3343_v13, %v3342_v10 }
 0x276   :  { %4131 = vmatpush3.bf16.xpose.msk.msra.mxu0 %vm4427_vm1, %v4129_v26  ;;  %v3344_v26 = vld [vmem:[%s6057_s0 + $0x5f0] sm:$0xff] }
 0x277   :  { %4179 = vmatpush3.bf16.xpose.msk.msra.mxu1 %vm4427_vm1, %v4177_v27  ;;  %4134 = vmatprep.subr.msk.bf16.mxu0 %vm4427_vm1, %v4132_v28  ;;  %v3345_v27 = vld [vmem:[%s6057_s0 + $0x5f8] sm:$0xff]  ;;  %v4153_v28 = vpack.c.bf16 %v3295_v19, %v3294_v18 }
 0x278   :  { %4182 = vmatprep.subr.msk.bf16.mxu1 %vm4427_vm1, %v4180_v29  ;;  %v4201_v29 = vpack.c.bf16 %v3327_v22, %v3326_v21  ;;  %v4204_v31 = vpack.c.bf16 %v3345_v27, %v3344_v26 }
 0x27e   :  { %4137 = vmatpush3.bf16.xpose.msk.msra.mxu0 %vm4427_vm1, %v4135_v38  ;;  %v5498_v38 = vld [vmem:[%s6058_s1 + $0x8] sm:$0xff] }
 0x27f   :  { %4185 = vmatpush3.bf16.xpose.msk.msra.mxu1 %vm4427_vm1, %v4183_v39  ;;  %4140 = vmatprep.subr.msk.bf16.mxu0 %vm4427_vm1, %v4138_v44  ;;  %v5511_v39 = vld [vmem:[%s6058_s1 + $0x10] sm:$0xff]  ;;  %v5524_v44 = vld [vmem:[%s6058_s1 + $0x18] sm:$0xff] }
 0x280   :  { %4188 = vmatprep.subr.msk.bf16.mxu1 %vm4427_vm1, %v4186_v45 }
 0x286   :  { %4143 = vmatpush3.bf16.xpose.msk.msra.mxu0 %vm4427_vm1, %v4141_v58 }
 0x287   :  { %4191 = vmatpush3.bf16.xpose.msk.msra.mxu1 %vm4427_vm1, %v4189_v61  ;;  %4146 = vmatprep.subr.msk.bf16.mxu0 %vm4427_vm1, %v4144_v63 }
 0x288   :  { %4194 = vmatprep.subr.msk.bf16.mxu1 %vm4427_vm1, %v4192_v0 }
 0x28e   :  { %4149 = vmatpush3.bf16.xpose.msk.msra.mxu0 %vm4427_vm1, %v4147_v14 }
 0x28f   :  { %4197 = vmatpush3.bf16.xpose.msk.msra.mxu1 %vm4427_vm1, %v4195_v11  ;;  %4152 = vmatprep.subr.msk.bf16.mxu0 %vm4427_vm1, %v4150_v20 }
 0x290   :  { %4200 = vmatprep.subr.msk.bf16.mxu1 %vm4427_vm1, %v4198_v16 }
 0x296   :  { %4155 = vmatpush3.bf16.xpose.msk.msra.mxu0 %vm4427_vm1, %v4153_v28 }
 0x297   :  { %4203 = vmatpush3.bf16.xpose.msk.msra.mxu1 %vm4427_vm1, %v4201_v29  ;;  %4158 = vmatprep.subr.msk.bf16.mxu0 %vm4427_vm1, %v4156_v30 }
 0x298   :  { %4206 = vmatprep.subr.msk.bf16.mxu1 %vm4427_vm1, %v4204_v31 }
 0x29e   :  { %4161 = vmatpush3.bf16.xpose.msk.msra.mxu0 %vm4427_vm1, %v4159_v36 }
 0x29f   :  { %4209 = vmatpush3.bf16.xpose.msk.msra.mxu1 %vm4427_vm1, %v4207_v37 }
 0x2a5   :  { %3763 = vmatmul.mubr.msk.f32.vlgmr.msra.gmra.mrb[32].mxu0 %vm115_vm0, %v5301_v15 }
 0x2a6   :  { %3803 = vmatmul.mubr.msk.f32.vlgmr.msra.gmra.mrb[32].mxu1 %vm115_vm0, %v5301_v15  ;;  %3764 = vmatprep.mubr.msk.f32.mxu0 %vm115_vm0, %v5498_v38 }
 0x2a7   :  { %3804 = vmatprep.mubr.msk.f32.mxu1 %vm115_vm0, %v5498_v38 }
 0x2a9   :  { %3765 = vmatmul.mubr.msk.f32.gmra.mrb[34].mxu0 %vm115_vm0, %v5498_v38 }
 0x2aa   :  { %3805 = vmatmul.mubr.msk.f32.gmra.mrb[34].mxu1 %vm115_vm0, %v5498_v38  ;;  %3766 = vmatprep.mubr.msk.f32.mxu0 %vm115_vm0, %v5511_v39 }
 0x2ab   :  { %3806 = vmatprep.mubr.msk.f32.mxu1 %vm115_vm0, %v5511_v39 }
 0x2ad   :  { %3767 = vmatmul.mubr.msk.f32.gmra.mrb[36].mxu0 %vm115_vm0, %v5511_v39 }
 0x2ae   :  { %3807 = vmatmul.mubr.msk.f32.gmra.mrb[36].mxu1 %vm115_vm0, %v5511_v39  ;;  %3768 = vmatprep.mubr.msk.f32.mxu0 %vm115_vm0, %v5524_v44 }
 0x2af   :  { %3808 = vmatprep.mubr.msk.f32.mxu1 %vm115_vm0, %v5524_v44 }
 0x2b1   :  { %3769 = vmatmul.mubr.msk.f32.gmra.mrb[38].mxu0 %vm115_vm0, %v5524_v44 }
 0x2b2   :  { %3809 = vmatmul.mubr.msk.f32.gmra.mrb[38].mxu1 %vm115_vm0, %v5524_v44  ;;  %2095 = vmatprep.mubr.f32.mxu0 %v4385_v43 }
 0x2b3   :  { %2184 = vmatprep.mubr.f32.mxu1 %v4385_v43 }
 0x333   :  { %v1365_v45 = vpop.f32.mrb[24].mxu0 }
 0x334   :  { %v1454_v50 = vpop.f32.mrb[24].mxu1  ;;  %v1366_v51 = vadd.f32 %v1365_v45, %v5125_v40  ;;  %v1367_v42 = vpop.f32.mrb[25].mxu0 }
 0x335   :  { %v1455_v55 = vadd.f32 %v1454_v50, %v5125_v40  ;;  %v1456_v56 = vpop.f32.mrb[25].mxu1  ;;  %v1368_v57 = vadd.f32 %v1367_v42, %v5125_v40 }
 0x336   :  { %v1457_v60 = vadd.f32 %v1456_v56, %v5125_v40  ;;  %v1477_v62 = vmax.f32 %v1366_v51, 0.0 }
 0x337   :  { %v1479_v58 = vmax.f32 %v1455_v55, 0.0  ;;  %v1478_v61 = vmax.f32 %v1368_v57, 0.0  ;;  %v1371_v0 = vpop.f32.mrb[26].mxu0 }
 0x338   :  { %v1480_v63 = vmax.f32 %v1457_v60, 0.0  ;;  %v1460_v6 = vpop.f32.mrb[26].mxu1  ;;  %v1372_v1 = vadd.f32 %v1371_v0, %v5123_v48  ;;  %v1373_v3 = vpop.f32.mrb[27].mxu0  ;;  %v1493_v13 = vmul.f32 %v1477_v62, %v5131_v47 }
 0x339   :  { %v1461_v2 = vadd.f32 %v1460_v6, %v5123_v48  ;;  %v1462_v7 = vpop.f32.mrb[27].mxu1  ;;  %v1374_v9 = vadd.f32 %v1373_v3, %v5123_v48  ;;  %v1495_v14 = vmul.f32 %v1479_v58, %v5131_v47  ;;  %v1494_v16 = vmul.f32 %v1478_v61, %v5131_v47 }
 0x33a   :  { %v1463_v10 = vadd.f32 %v1462_v7, %v5123_v48  ;;  %v1481_v11 = vmax.f32 %v1372_v1, 0.0  ;;  %v1496_v18 = vmul.f32 %v1480_v63, %v5131_v47 }
 0x33b   :  { %v1483_v20 = vmax.f32 %v1461_v2, 0.0  ;;  %v1482_v19 = vmax.f32 %v1374_v9, 0.0  ;;  %v1377_v22 = vpop.f32.mrb[28].mxu0 }
 0x33c   :  { %v1484_v21 = vmax.f32 %v1463_v10, 0.0  ;;  %v1466_v24 = vpop.f32.mrb[28].mxu1  ;;  %v1497_v25 = vmul.f32 %v1481_v11, %v5141_v8  ;;  %v1378_v27 = vadd.f32 %v1377_v22, %v5127_v41  ;;  %v1379_v29 = vpop.f32.mrb[29].mxu0 }
 0x33d   :  { %v1499_v26 = vmul.f32 %v1483_v20, %v5141_v8  ;;  %v1467_v28 = vadd.f32 %v1466_v24, %v5127_v41  ;;  %v1468_v30 = vpop.f32.mrb[29].mxu1  ;;  %v1498_v31 = vmul.f32 %v1482_v19, %v5141_v8  ;;  %v1380_v33 = vadd.f32 %v1379_v29, %v5127_v41 }
 0x33e   :  { %v1500_v32 = vmul.f32 %v1484_v21, %v5141_v8  ;;  %v1469_v34 = vadd.f32 %v1468_v30, %v5127_v41  ;;  %v1509_v35 = vadd.f32 %v1497_v25, %v1493_v13  ;;  %v1485_v37 = vmax.f32 %v1378_v27, 0.0 }
 0x33f   :  { %v1527_v36 = vadd.f32 %v1499_v26, %v1495_v14  ;;  %v1487_v45 = vmax.f32 %v1467_v28, 0.0  ;;  %v1518_v50 = vadd.f32 %v1498_v31, %v1494_v16  ;;  %v1486_v55 = vmax.f32 %v1380_v33, 0.0  ;;  %v1383_v56 = vpop.f32.mrb[30].mxu0 }
 0x340   :  { %v1536_v51 = vadd.f32 %v1500_v32, %v1496_v18  ;;  %v1488_v42 = vmax.f32 %v1469_v34, 0.0  ;;  %v1472_v57 = vpop.f32.mrb[30].mxu1  ;;  %v1501_v60 = vmul.f32 %v1485_v37, %v5143_v12  ;;  %v1384_v58 = vadd.f32 %v1383_v56, %v5129_v46  ;;  %v1385_v63 = vpop.f32.mrb[31].mxu0 }
 0x341   :  { %v1503_v62 = vmul.f32 %v1487_v45, %v5143_v12  ;;  %v1473_v61 = vadd.f32 %v1472_v57, %v5129_v46  ;;  %v1474_v0 = vpop.f32.mrb[31].mxu1  ;;  %v1502_v6 = vmul.f32 %v1486_v55, %v5143_v12  ;;  %v1386_v2 = vadd.f32 %v1385_v63, %v5129_v46 }
 0x342   :  { %v1504_v1 = vmul.f32 %v1488_v42, %v5143_v12  ;;  %v1475_v3 = vadd.f32 %v1474_v0, %v5129_v46  ;;  %v1510_v7 = vadd.f32 %v1509_v35, %v1501_v60  ;;  %v1489_v10 = vmax.f32 %v1384_v58, 0.0 }
 0x343   :  { %v1528_v9 = vadd.f32 %v1527_v36, %v1503_v62  ;;  %v1491_v13 = vmax.f32 %v1473_v61, 0.0  ;;  %v1519_v14 = vadd.f32 %v1518_v50, %v1502_v6  ;;  %v1490_v20 = vmax.f32 %v1386_v2, 0.0 }
 0x344   :  { %v1537_v11 = vadd.f32 %v1536_v51, %v1504_v1  ;;  %v1492_v16 = vmax.f32 %v1475_v3, 0.0  ;;  %v1505_v18 = vmul.f32 %v1489_v10, %v5161_v54 }
 0x345   :  { %v1507_v19 = vmul.f32 %v1491_v13, %v5161_v54  ;;  %v1506_v21 = vmul.f32 %v1490_v20, %v5161_v54 }
 0x346   :  { %v1508_v22 = vmul.f32 %v1492_v16, %v5161_v54  ;;  %v1511_v24 = vadd.f32 %v1510_v7, %v1505_v18 }
 0x347   :  { %v1529_v25 = vadd.f32 %v1528_v9, %v1507_v19  ;;  %v1520_v26 = vadd.f32 %v1519_v14, %v1506_v21 }
 0x348   :  { %v1538_v27 = vadd.f32 %v1537_v11, %v1508_v22  ;;  %v1512_v28 = vrot.slane %v1511_v24, 4 }
 0x349   :  { %v1530_v29 = vrot.slane %v1529_v25, 4  ;;  %v1521_v30 = vrot.slane %v1520_v26, 4 }
 0x34a   :  { %v1539_v31 = vrot.slane %v1538_v27, 4  ;;  %v1513_v32 = vadd.f32 %v1512_v28, %v1511_v24 }
 0x34b   :  { %v1531_v33 = vadd.f32 %v1530_v29, %v1529_v25  ;;  %v1522_v34 = vadd.f32 %v1521_v30, %v1520_v26 }
 0x34c   :  { %v1540_v35 = vadd.f32 %v1539_v31, %v1538_v27  ;;  %v1514_v36 = vrot.slane %v1513_v32, 2 }
 0x34d   :  { %v1532_v37 = vrot.slane %v1531_v33, 2  ;;  %v1523_v45 = vrot.slane %v1522_v34, 2 }
 0x34e   :  { %v1541_v50 = vrot.slane %v1540_v35, 2  ;;  %v1515_v51 = vadd.f32 %v1514_v36, %v1513_v32 }
 0x34f   :  { %v1533_v55 = vadd.f32 %v1532_v37, %v1531_v33  ;;  %v1524_v42 = vadd.f32 %v1523_v45, %v1522_v34 }
 0x350   :  { %v1542_v56 = vadd.f32 %v1541_v50, %v1540_v35  ;;  %v1516_v57 = vrot.slane %v1515_v51, 1 }
 0x351   :  { %v1534_v60 = vrot.slane %v1533_v55, 1  ;;  %v1525_v62 = vrot.slane %v1524_v42, 1 }
 0x352   :  { %v1543_v58 = vrot.slane %v1542_v56, 1  ;;  %v1517_v61 = vadd.f32 %v1516_v57, %v1515_v51 }
 0x353   :  { %v1535_v63 = vadd.f32 %v1534_v60, %v1533_v55  ;;  %v1526_v0 = vadd.f32 %v1525_v62, %v1524_v42 }
 0x354   :  { %v1544_v6 = vadd.f32 %v1543_v58, %v1542_v56  ;;  %v1545_v1 = vadd.f32 %v1517_v61, %v5171_v52 }
 0x355   :  { %v1547_v2 = vadd.f32 %v1535_v63, %v5171_v52  ;;  %v1546_v3 = vadd.f32 %v1526_v0, %v5171_v52 }
 0x356   :  { %v1548_v7 = vadd.f32 %v1544_v6, %v5171_v52 }
 0x357   :  { %v1553_v9 = vcombine.low %v1545_v1, %v1546_v3 }
 0x358   :  { %v1554_v10 = vcombine.low %v1547_v2, %v1548_v7 }
 0x359   :  { %v1561_v13 = vrot.slane %v1553_v9, %v5175_v5 }
 0x35a   :  { %v1568_v14 = vrot.slane %v1554_v10, %v5175_v5 }
 0x35c   :  { %v1569_v11 = vcombine.low %v1561_v13, %v1568_v14 }
 0x35e   :  { %v1576_v20 = vrot.slane %v1569_v11, %v5175_v5 }
 0x360   :  { %1579 = vst.msk [vmem:[#allocation2 + $0x4] sm:$0xf] %vm5181_vm3, %v1576_v20 }
 0x378   :  { %v1903_v16 = vpop.f32.mrb[32].mxu0 }
 0x379   :  { %v1992_v18 = vpop.f32.mrb[32].mxu1  ;;  %v1905_v19 = vpop.f32.mrb[33].mxu0  ;;  %v1904_v22 = vadd.f32 %v1903_v16, %v4766_v49 }
 0x37a   :  { %v1994_v21 = vpop.f32.mrb[33].mxu1  ;;  %v1993_v24 = vadd.f32 %v1992_v18, %v4766_v49  ;;  %v1906_v25 = vadd.f32 %v1905_v19, %v4766_v49  ;;  %v3442_v18 = vld [vmem:[%s6057_s0 + $0x680] sm:$0xff]  ;;  %v3443_v19 = vld [vmem:[%s6057_s0 + $0x688] sm:$0xff] }
 0x37b   :  { %v1995_v26 = vadd.f32 %v1994_v21, %v4766_v49  ;;  %v2015_v35 = vmax.f32 %v1904_v22, 0.0 }
 0x37c   :  { %v1909_v27 = vpop.f32.mrb[34].mxu0  ;;  %v2017_v36 = vmax.f32 %v1993_v24, 0.0  ;;  %v2016_v50 = vmax.f32 %v1906_v25, 0.0 }
 0x37d   :  { %v1998_v28 = vpop.f32.mrb[34].mxu1  ;;  %v1910_v29 = vadd.f32 %v1909_v27, %v4769_v53  ;;  %v1911_v31 = vpop.f32.mrb[35].mxu0  ;;  %v2018_v51 = vmax.f32 %v1995_v26, 0.0  ;;  %v3474_v26 = vld [vmem:[%s6057_s0 + $0x780] sm:$0xff]  ;;  %v3475_v27 = vld [vmem:[%s6057_s0 + $0x788] sm:$0xff] }
 0x37e   :  { %v1999_v30 = vadd.f32 %v1998_v28, %v4769_v53  ;;  %v2000_v32 = vpop.f32.mrb[35].mxu1  ;;  %v1912_v33 = vadd.f32 %v1911_v31, %v4769_v53 }
 0x37f   :  { %v2001_v34 = vadd.f32 %v2000_v32, %v4769_v53  ;;  %v2019_v37 = vmax.f32 %v1910_v29, 0.0 }
 0x380   :  { %v2021_v45 = vmax.f32 %v1999_v30, 0.0  ;;  %v2020_v55 = vmax.f32 %v1912_v33, 0.0  ;;  %v1915_v56 = vpop.f32.mrb[36].mxu0 }
 0x381   :  { %v2022_v42 = vmax.f32 %v2001_v34, 0.0  ;;  %v2004_v57 = vpop.f32.mrb[36].mxu1  ;;  %v4212_v60 = vpack.c.bf16 %v2019_v37, %v2015_v35  ;;  %v1917_v58 = vpop.f32.mrb[37].mxu0  ;;  %v1916_v6 = vadd.f32 %v1915_v56, %v4773_v59  ;;  %v4274_v37 = vpack.c.bf16 %v3475_v27, %v3474_v26  ;;  %v5627_v56 = vld [vmem:[%s6059_s2] sm:$0xff]  ;;  %v3463_v26 = vld [vmem:[%s6057_s0 + $0x728] sm:$0xff]  ;;  %v3448_v27 = vld [vmem:[%s6057_s0 + $0x6b0] sm:$0xff] }
 0x382   :  { %v4220_v62 = vpack.c.bf16 %v2021_v45, %v2017_v36  ;;  %v2006_v61 = vpop.f32.mrb[37].mxu1  ;;  %v4210_v63 = vpack.c.bf16 %v2020_v55, %v2016_v50  ;;  %v2005_v1 = vadd.f32 %v2004_v57, %v4773_v59  ;;  %v1918_v2 = vadd.f32 %v1917_v58, %v4773_v59  ;;  %v3426_v45 = vld [vmem:[%s6057_s0 + $0x600] sm:$0xff]  ;;  %v3427_v50 = vld [vmem:[%s6057_s0 + $0x608] sm:$0xff]  ;;  %v3445_v57 = vld [vmem:[%s6057_s0 + $0x698] sm:$0xff] }
 0x383   :  { %v4218_v0 = vpack.c.bf16 %v2022_v42, %v2018_v51  ;;  %v2007_v3 = vadd.f32 %v2006_v61, %v4773_v59  ;;  %v2023_v21 = vmax.f32 %v1916_v6, 0.0  ;;  %v4226_v36 = vpack.c.bf16 %v3443_v19, %v3442_v18  ;;  %v3458_v51 = vld [vmem:[%s6057_s0 + $0x700] sm:$0xff]  ;;  %v3459_v55 = vld [vmem:[%s6057_s0 + $0x708] sm:$0xff]  ;;  %v3444_v42 = vld [vmem:[%s6057_s0 + $0x690] sm:$0xff] }
 0x384   :  { %v1921_v7 = vpop.f32.mrb[38].mxu0  ;;  %4211 = vmatprep.subr.bf16.mxu0 %v4210_v63  ;;  %v2025_v22 = vmax.f32 %v2005_v1, 0.0  ;;  %v2024_v28 = vmax.f32 %v1918_v2, 0.0  ;;  %v4229_v58 = vpack.c.bf16 %v3427_v50, %v3426_v45  ;;  %v4277_v61 = vpack.c.bf16 %v3459_v55, %v3458_v51  ;;  %v5647_v6 = vld [vmem:[%s6059_s2 + $0x8] sm:$0xff]  ;;  %v3428_v1 = vld [vmem:[%s6057_s0 + $0x610] sm:$0xff]  ;;  %v3429_v2 = vld [vmem:[%s6057_s0 + $0x618] sm:$0xff] }
 0x385   :  { %v2010_v9 = vpop.f32.mrb[38].mxu1  ;;  %4219 = vmatprep.subr.bf16.mxu1 %v4218_v0  ;;  %v1922_v10 = vadd.f32 %v1921_v7, %v4783_v23  ;;  %v1923_v14 = vpop.f32.mrb[39].mxu0  ;;  %4213 = vmatpush1.bf16.msra.mxu0 %v4212_v60  ;;  %v2026_v29 = vmax.f32 %v2007_v3, 0.0  ;;  %v3476_v60 = vld [vmem:[%s6057_s0 + $0x790] sm:$0xff]  ;;  %v4232_v63 = vpack.c.bf16 %v3445_v57, %v3444_v42  ;;  %v3461_v7 = vld [vmem:[%s6057_s0 + $0x718] sm:$0xff]  ;;  %v3450_v50 = vld [vmem:[%s6057_s0 + $0x6c0] sm:$0xff] }
 0x386   :  { %v2011_v13 = vadd.f32 %v2010_v9, %v4783_v23  ;;  %v2012_v11 = vpop.f32.mrb[39].mxu1  ;;  %4221 = vmatpush1.bf16.msra.mxu1 %v4220_v62  ;;  %v1924_v20 = vadd.f32 %v1923_v14, %v4783_v23  ;;  %v3477_v62 = vld [vmem:[%s6057_s0 + $0x798] sm:$0xff]  ;;  %v3460_v3 = vld [vmem:[%s6057_s0 + $0x710] sm:$0xff]  ;;  %v3446_v9 = vld [vmem:[%s6057_s0 + $0x6a0] sm:$0xff] }
 0x387   :  { %v2013_v16 = vadd.f32 %v2012_v11, %v4783_v23  ;;  %v2027_v24 = vmax.f32 %v1922_v10, 0.0  ;;  %v4280_v0 = vpack.c.bf16 %v3477_v62, %v3476_v60  ;;  %v5681_v10 = vld [vmem:[%s6059_s2 + $0x10] sm:$0xff]  ;;  %v3478_v14 = vld [vmem:[%s6057_s0 + $0x7a0] sm:$0xff]  ;;  %v3479_v11 = vld [vmem:[%s6057_s0 + $0x7a8] sm:$0xff] }
 0x388   :  { %v2029_v25 = vmax.f32 %v2011_v13, 0.0  ;;  %v2028_v30 = vmax.f32 %v1924_v20, 0.0  ;;  %v3447_v13 = vld [vmem:[%s6057_s0 + $0x6a8] sm:$0xff]  ;;  %v4235_v20 = vpack.c.bf16 %v3429_v2, %v3428_v1  ;;  %v4286_v19 = vpack.c.bf16 %v3479_v11, %v3478_v14  ;;  %v3465_v45 = vld [vmem:[%s6057_s0 + $0x738] sm:$0xff]  ;;  %v3482_v55 = vld [vmem:[%s6057_s0 + $0x7c0] sm:$0xff] }
 0x389   :  { %v2030_v31 = vmax.f32 %v2013_v16, 0.0  ;;  %v4216_v32 = vpack.c.bf16 %v2027_v24, %v2023_v21  ;;  %v4283_v16 = vpack.c.bf16 %v3461_v7, %v3460_v3  ;;  %v4238_v18 = vpack.c.bf16 %v3447_v13, %v3446_v9  ;;  %v5701_v21 = vld [vmem:[%s6059_s2 + $0x18] sm:$0xff]  ;;  %v3431_v24 = vld [vmem:[%s6057_s0 + $0x628] sm:$0xff]  ;;  %v3452_v2 = vld [vmem:[%s6057_s0 + $0x6d0] sm:$0xff] }
 0x38a   :  { %v4224_v33 = vpack.c.bf16 %v2029_v25, %v2025_v22  ;;  %v4214_v34 = vpack.c.bf16 %v2028_v30, %v2024_v28  ;;  %v3430_v22 = vld [vmem:[%s6057_s0 + $0x620] sm:$0xff]  ;;  %v3449_v28 = vld [vmem:[%s6057_s0 + $0x6b8] sm:$0xff]  ;;  %v3451_v51 = vld [vmem:[%s6057_s0 + $0x6c8] sm:$0xff] }
 0x38b   :  { %v4222_v35 = vpack.c.bf16 %v2030_v31, %v2026_v29  ;;  %v3462_v25 = vld [vmem:[%s6057_s0 + $0x720] sm:$0xff]  ;;  %v3480_v29 = vld [vmem:[%s6057_s0 + $0x7b0] sm:$0xff]  ;;  %v3481_v30 = vld [vmem:[%s6057_s0 + $0x7b8] sm:$0xff]  ;;  %v4241_v31 = vpack.c.bf16 %v3431_v24, %v3430_v22  ;;  %v4250_v62 = vpack.c.bf16 %v3451_v51, %v3450_v50 }
 0x38c   :  { %4215 = vmatprep.subr.bf16.mxu0 %v4214_v34  ;;  %v4292_v34 = vpack.c.bf16 %v3481_v30, %v3480_v29  ;;  %v3483_v42 = vld [vmem:[%s6057_s0 + $0x7c8] sm:$0xff]  ;;  %v3453_v3 = vld [vmem:[%s6057_s0 + $0x6d8] sm:$0xff]  ;;  %v3484_v7 = vld [vmem:[%s6057_s0 + $0x7d0] sm:$0xff] }
 0x38d   :  { %4223 = vmatprep.subr.bf16.mxu1 %v4222_v35  ;;  %4217 = vmatpush1.bf16.msra.mxu0 %v4216_v32  ;;  %v4289_v32 = vpack.c.bf16 %v3463_v26, %v3462_v25  ;;  %v3432_v35 = vld [vmem:[%s6057_s0 + $0x630] sm:$0xff]  ;;  %v3467_v1 = vld [vmem:[%s6057_s0 + $0x748] sm:$0xff]  ;;  %v3485_v9 = vld [vmem:[%s6057_s0 + $0x7d8] sm:$0xff]  ;;  %v4256_v11 = vpack.c.bf16 %v3453_v3, %v3452_v2 }
 0x38e   :  { %4225 = vmatpush1.bf16.msra.mxu1 %v4224_v33  ;;  %4228 = vmatprep.subr.msk.bf16.mxu0 %vm4427_vm1, %v4226_v36  ;;  %v4244_v33 = vpack.c.bf16 %v3449_v28, %v3448_v27  ;;  %v3433_v36 = vld [vmem:[%s6057_s0 + $0x638] sm:$0xff]  ;;  %v3454_v24 = vld [vmem:[%s6057_s0 + $0x6e0] sm:$0xff]  ;;  %v3455_v25 = vld [vmem:[%s6057_s0 + $0x6e8] sm:$0xff] }
 0x38f   :  { %4276 = vmatprep.subr.msk.bf16.mxu1 %vm4427_vm1, %v4274_v37  ;;  %v3464_v37 = vld [vmem:[%s6057_s0 + $0x730] sm:$0xff]  ;;  %v4247_v57 = vpack.c.bf16 %v3433_v36, %v3432_v35  ;;  %v3469_v22 = vld [vmem:[%s6057_s0 + $0x758] sm:$0xff]  ;;  %v3486_v26 = vld [vmem:[%s6057_s0 + $0x7e0] sm:$0xff]  ;;  %v4262_v30 = vpack.c.bf16 %v3455_v25, %v3454_v24 }
 0x390   :  { %3418 = vmatmul.mubr.msk.f32.vlgmr.msra.gmra.mrb[40].mxu0 %vm530_vm2, %v5627_v56  ;;  %v4295_v60 = vpack.c.bf16 %v3465_v45, %v3464_v37  ;;  %v3487_v27 = vld [vmem:[%s6057_s0 + $0x7e8] sm:$0xff]  ;;  %v3456_v36 = vld [vmem:[%s6057_s0 + $0x6f0] sm:$0xff]  ;;  %v3457_v37 = vld [vmem:[%s6057_s0 + $0x6f8] sm:$0xff] }
 0x391   :  { %3422 = vmatmul.mubr.msk.f32.vlgmr.msra.gmra.mrb[40].mxu1 %vm530_vm2, %v5627_v56  ;;  %2101 = vmatprep.mubr.f32.mxu0 %v4385_v43  ;;  %v3471_v35 = vld [vmem:[%s6057_s0 + $0x768] sm:$0xff]  ;;  %v3488_v45 = vld [vmem:[%s6057_s0 + $0x7f0] sm:$0xff]  ;;  %v3489_v50 = vld [vmem:[%s6057_s0 + $0x7f8] sm:$0xff] }
 0x392   :  { %2190 = vmatprep.mubr.f32.mxu1 %v4385_v43 }
 0x394   :  { %3419 = vmatmul.mubr.msk.f32.gmra.mrb[42].mxu0 %vm530_vm2, %v5647_v6 }
 0x395   :  { %3423 = vmatmul.mubr.msk.f32.gmra.mrb[42].mxu1 %vm530_vm2, %v5647_v6  ;;  %2107 = vmatprep.mubr.f32.mxu0 %v4385_v43 }
 0x396   :  { %2196 = vmatprep.mubr.f32.mxu1 %v4385_v43  ;;  %4231 = vmatpush3.bf16.xpose.msk.msra.mxu0 %vm4427_vm1, %v4229_v58  ;;  %v4298_v58 = vpack.c.bf16 %v3483_v42, %v3482_v55  ;;  %v4268_v42 = vpack.c.bf16 %v3457_v37, %v3456_v36 }
 0x397   :  { %4279 = vmatpush3.bf16.xpose.msk.msra.mxu1 %vm4427_vm1, %v4277_v61  ;;  %4234 = vmatprep.subr.msk.bf16.mxu0 %vm4427_vm1, %v4232_v63  ;;  %v3434_v61 = vld [vmem:[%s6057_s0 + $0x640] sm:$0xff]  ;;  %v3435_v63 = vld [vmem:[%s6057_s0 + $0x648] sm:$0xff] }
 0x398   :  { %4282 = vmatprep.subr.msk.bf16.mxu1 %vm4427_vm1, %v4280_v0  ;;  %3420 = vmatmul.mubr.msk.f32.gmra.mrb[44].mxu0 %vm530_vm2, %v5681_v10  ;;  %v3466_v0 = vld [vmem:[%s6057_s0 + $0x740] sm:$0xff]  ;;  %v4253_v13 = vpack.c.bf16 %v3435_v63, %v3434_v61  ;;  %v3473_v61 = vld [vmem:[%s6057_s0 + $0x778] sm:$0xff] }
 0x399   :  { %3424 = vmatmul.mubr.msk.f32.gmra.mrb[44].mxu1 %vm530_vm2, %v5681_v10  ;;  %2113 = vmatprep.mubr.f32.mxu0 %v4385_v43  ;;  %v4301_v14 = vpack.c.bf16 %v3467_v1, %v3466_v0 }
 0x39a   :  { %2202 = vmatprep.mubr.f32.mxu1 %v4385_v43 }
 0x39c   :  { %3421 = vmatmul.mubr.msk.f32.gmra.mrb[46].mxu0 %vm530_vm2, %v5701_v21 }
 0x39d   :  { %3425 = vmatmul.mubr.msk.f32.gmra.mrb[46].mxu1 %vm530_vm2, %v5701_v21  ;;  %3842 = vmatprep.mubr.msk.f32.mxu0 %vm115_vm0, %v5301_v15 }
 0x39e   :  { %3882 = vmatprep.mubr.msk.f32.mxu1 %vm115_vm0, %v5301_v15  ;;  %4237 = vmatpush3.bf16.xpose.msk.msra.mxu0 %vm4427_vm1, %v4235_v20  ;;  %v4304_v20 = vpack.c.bf16 %v3485_v9, %v3484_v7 }
 0x39f   :  { %4285 = vmatpush3.bf16.xpose.msk.msra.mxu1 %vm4427_vm1, %v4283_v16  ;;  %4240 = vmatprep.subr.msk.bf16.mxu0 %vm4427_vm1, %v4238_v18  ;;  %v3436_v16 = vld [vmem:[%s6057_s0 + $0x650] sm:$0xff]  ;;  %v3437_v18 = vld [vmem:[%s6057_s0 + $0x658] sm:$0xff] }
 0x3a0   :  { %4288 = vmatprep.subr.msk.bf16.mxu1 %vm4427_vm1, %v4286_v19  ;;  %v3468_v19 = vld [vmem:[%s6057_s0 + $0x750] sm:$0xff]  ;;  %v4259_v28 = vpack.c.bf16 %v3437_v18, %v3436_v16 }
 0x3a1   :  { %v4307_v29 = vpack.c.bf16 %v3469_v22, %v3468_v19 }
 0x3a6   :  { %4243 = vmatpush3.bf16.xpose.msk.msra.mxu0 %vm4427_vm1, %v4241_v31  ;;  %v4310_v31 = vpack.c.bf16 %v3487_v27, %v3486_v26 }
 0x3a7   :  { %4291 = vmatpush3.bf16.xpose.msk.msra.mxu1 %vm4427_vm1, %v4289_v32  ;;  %4246 = vmatprep.subr.msk.bf16.mxu0 %vm4427_vm1, %v4244_v33  ;;  %v3438_v32 = vld [vmem:[%s6057_s0 + $0x660] sm:$0xff]  ;;  %v3439_v33 = vld [vmem:[%s6057_s0 + $0x668] sm:$0xff] }
 0x3a8   :  { %4294 = vmatprep.subr.msk.bf16.mxu1 %vm4427_vm1, %v4292_v34  ;;  %v3470_v34 = vld [vmem:[%s6057_s0 + $0x760] sm:$0xff]  ;;  %v4265_v51 = vpack.c.bf16 %v3439_v33, %v3438_v32 }
 0x3a9   :  { %v4313_v55 = vpack.c.bf16 %v3471_v35, %v3470_v34 }
 0x3ae   :  { %4249 = vmatpush3.bf16.xpose.msk.msra.mxu0 %vm4427_vm1, %v4247_v57  ;;  %v4316_v57 = vpack.c.bf16 %v3489_v50, %v3488_v45 }
 0x3af   :  { %4297 = vmatpush3.bf16.xpose.msk.msra.mxu1 %vm4427_vm1, %v4295_v60  ;;  %4252 = vmatprep.subr.msk.bf16.mxu0 %vm4427_vm1, %v4250_v62  ;;  %v3440_v60 = vld [vmem:[%s6057_s0 + $0x670] sm:$0xff]  ;;  %v3441_v62 = vld [vmem:[%s6057_s0 + $0x678] sm:$0xff] }
 0x3b0   :  { %4300 = vmatprep.subr.msk.bf16.mxu1 %vm4427_vm1, %v4298_v58  ;;  %v3472_v58 = vld [vmem:[%s6057_s0 + $0x770] sm:$0xff]  ;;  %v4271_v63 = vpack.c.bf16 %v3441_v62, %v3440_v60  ;;  %s4390_s0 = smov [#allocation2]  }
 0x3b1   :  { %v4319_v0 = vpack.c.bf16 %v3473_v61, %v3472_v58  ;;  %s3050_s25 = sshll.u32 %s4390_s0, 4  ;;  %s3051_s25 = int_to_ptr.vmem [resolvable:$true] %s3050_s25 }
 0x3b2   :  { %s4360_s26 = scalar_lea.vmem %s3051_s25, 256  ;;  %p4365_p1 = scmp.lt.s32.totalorder %s3051_s25, %s3051_s25 }
 0x3b3   :  { %p4361_p0 = scmp.ne.s32.totalorder %s3051_s25, %s4360_s26  ;;  %p4366_p2 = scmp.lt.s32.totalorder %s4360_s26, %s4360_s26 }
 0x3b5   :  { %p4367_p3 = por %p4366_p2, %p4365_p1 }
 0x3b6   :  { %4255 = vmatpush3.bf16.xpose.msk.msra.mxu0 %vm4427_vm1, %v4253_v13 }
 0x3b7   :  { %4303 = vmatpush3.bf16.xpose.msk.msra.mxu1 %vm4427_vm1, %v4301_v14  ;;  %4258 = vmatprep.subr.msk.bf16.mxu0 %vm4427_vm1, %v4256_v11  ;;  %p4368_p4 = pnand %p4367_p3, %p4361_p0 }
 0x3b8   :  { %4306 = vmatprep.subr.msk.bf16.mxu1 %vm4427_vm1, %v4304_v20 }
 0x3be   :  { %4261 = vmatpush3.bf16.xpose.msk.msra.mxu0 %vm4427_vm1, %v4259_v28 }
 0x3bf   :  { %4309 = vmatpush3.bf16.xpose.msk.msra.mxu1 %vm4427_vm1, %v4307_v29  ;;  %4264 = vmatprep.subr.msk.bf16.mxu0 %vm4427_vm1, %v4262_v30 }
 0x3c0   :  { %4312 = vmatprep.subr.msk.bf16.mxu1 %vm4427_vm1, %v4310_v31 }
 0x3c6   :  { %4267 = vmatpush3.bf16.xpose.msk.msra.mxu0 %vm4427_vm1, %v4265_v51 }
 0x3c7   :  { %4315 = vmatpush3.bf16.xpose.msk.msra.mxu1 %vm4427_vm1, %v4313_v55  ;;  %4270 = vmatprep.subr.msk.bf16.mxu0 %vm4427_vm1, %v4268_v42 }
 0x3c8   :  { %4318 = vmatprep.subr.msk.bf16.mxu1 %vm4427_vm1, %v4316_v57 }
 0x3ce   :  { %4273 = vmatpush3.bf16.xpose.msk.msra.mxu0 %vm4427_vm1, %v4271_v63 }
 0x3cf   :  { %4321 = vmatpush3.bf16.xpose.msk.msra.mxu1 %vm4427_vm1, %v4319_v0 }
 0x3d5   :  { %3843 = vmatmul.mubr.msk.f32.vlgmr.msra.gmra.mrb[48].mxu0 %vm115_vm0, %v5301_v15 }
 0x3d6   :  { %3883 = vmatmul.mubr.msk.f32.vlgmr.msra.gmra.mrb[48].mxu1 %vm115_vm0, %v5301_v15  ;;  %3844 = vmatprep.mubr.msk.f32.mxu0 %vm115_vm0, %v5498_v38 }
 0x3d7   :  { %3884 = vmatprep.mubr.msk.f32.mxu1 %vm115_vm0, %v5498_v38 }
 0x3d9   :  { %3845 = vmatmul.mubr.msk.f32.gmra.mrb[50].mxu0 %vm115_vm0, %v5498_v38 }
 0x3da   :  { %3885 = vmatmul.mubr.msk.f32.gmra.mrb[50].mxu1 %vm115_vm0, %v5498_v38  ;;  %3846 = vmatprep.mubr.msk.f32.mxu0 %vm115_vm0, %v5511_v39 }
 0x3db   :  { %3886 = vmatprep.mubr.msk.f32.mxu1 %vm115_vm0, %v5511_v39 }
 0x3dd   :  { %3847 = vmatmul.mubr.msk.f32.gmra.mrb[52].mxu0 %vm115_vm0, %v5511_v39 }
 0x3de   :  { %3887 = vmatmul.mubr.msk.f32.gmra.mrb[52].mxu1 %vm115_vm0, %v5511_v39  ;;  %3848 = vmatprep.mubr.msk.f32.mxu0 %vm115_vm0, %v5524_v44 }
 0x3df   :  { %3888 = vmatprep.mubr.msk.f32.mxu1 %vm115_vm0, %v5524_v44 }
 0x3e1   :  { %3849 = vmatmul.mubr.msk.f32.gmra.mrb[54].mxu0 %vm115_vm0, %v5524_v44 }
 0x3e2   :  { %3889 = vmatmul.mubr.msk.f32.gmra.mrb[54].mxu1 %vm115_vm0, %v5524_v44  ;;  %2827 = vmatprep.mubr.f32.mxu0 %v4385_v43 }
 0x3e3   :  { %2916 = vmatprep.mubr.f32.mxu1 %v4385_v43 }
 0x463   :  { %v2097_v4 = vpop.f32.mrb[40].mxu0 }
 0x464   :  { %v2186_v15 = vpop.f32.mrb[40].mxu1  ;;  %v2098_v38 = vadd.f32 %v2097_v4, %v5125_v40  ;;  %v2099_v1 = vpop.f32.mrb[41].mxu0 }
 0x465   :  { %v2187_v39 = vadd.f32 %v2186_v15, %v5125_v40  ;;  %v2188_v2 = vpop.f32.mrb[41].mxu1  ;;  %v2100_v3 = vadd.f32 %v2099_v1, %v5125_v40 }
 0x466   :  { %v2189_v7 = vadd.f32 %v2188_v2, %v5125_v40  ;;  %v2209_v9 = vmax.f32 %v2098_v38, 0.0 }
 0x467   :  { %v2211_v13 = vmax.f32 %v2187_v39, 0.0  ;;  %v2210_v14 = vmax.f32 %v2100_v3, 0.0  ;;  %v2103_v11 = vpop.f32.mrb[42].mxu0 }
 0x468   :  { %v2212_v44 = vmax.f32 %v2189_v7, 0.0  ;;  %v2192_v20 = vpop.f32.mrb[42].mxu1  ;;  %v2104_v16 = vadd.f32 %v2103_v11, %v5123_v48  ;;  %v2105_v19 = vpop.f32.mrb[43].mxu0  ;;  %v2225_v26 = vmul.f32 %v2209_v9, %v5131_v47 }
 0x469   :  { %v2193_v18 = vadd.f32 %v2192_v20, %v5123_v48  ;;  %v2194_v22 = vpop.f32.mrb[43].mxu1  ;;  %v2106_v24 = vadd.f32 %v2105_v19, %v5123_v48  ;;  %v2227_v27 = vmul.f32 %v2211_v13, %v5131_v47  ;;  %v2226_v30 = vmul.f32 %v2210_v14, %v5131_v47 }
 0x46a   :  { %v2195_v25 = vadd.f32 %v2194_v22, %v5123_v48  ;;  %v2213_v28 = vmax.f32 %v2104_v16, 0.0  ;;  %v2228_v31 = vmul.f32 %v2212_v44, %v5131_v47 }
 0x46b   :  { %v2215_v29 = vmax.f32 %v2193_v18, 0.0  ;;  %v2214_v32 = vmax.f32 %v2106_v24, 0.0  ;;  %v2109_v34 = vpop.f32.mrb[44].mxu0 }
 0x46c   :  { %v2216_v33 = vmax.f32 %v2195_v25, 0.0  ;;  %v2198_v35 = vpop.f32.mrb[44].mxu1  ;;  %v2229_v36 = vmul.f32 %v2213_v28, %v5141_v8  ;;  %v2110_v45 = vadd.f32 %v2109_v34, %v5127_v41  ;;  %v2111_v51 = vpop.f32.mrb[45].mxu0 }
 0x46d   :  { %v2231_v37 = vmul.f32 %v2215_v29, %v5141_v8  ;;  %v2199_v50 = vadd.f32 %v2198_v35, %v5127_v41  ;;  %v2200_v55 = vpop.f32.mrb[45].mxu1  ;;  %v2230_v42 = vmul.f32 %v2214_v32, %v5141_v8  ;;  %v2112_v60 = vadd.f32 %v2111_v51, %v5127_v41 }
 0x46e   :  { %v2232_v57 = vmul.f32 %v2216_v33, %v5141_v8  ;;  %v2201_v62 = vadd.f32 %v2200_v55, %v5127_v41  ;;  %v2241_v58 = vadd.f32 %v2229_v36, %v2225_v26  ;;  %v2217_v63 = vmax.f32 %v2110_v45, 0.0 }
 0x46f   :  { %v2259_v61 = vadd.f32 %v2231_v37, %v2227_v27  ;;  %v2219_v0 = vmax.f32 %v2199_v50, 0.0  ;;  %v2250_v4 = vadd.f32 %v2230_v42, %v2226_v30  ;;  %v2218_v38 = vmax.f32 %v2112_v60, 0.0  ;;  %v2115_v1 = vpop.f32.mrb[46].mxu0 }
 0x470   :  { %v2268_v15 = vadd.f32 %v2232_v57, %v2228_v31  ;;  %v2220_v39 = vmax.f32 %v2201_v62, 0.0  ;;  %v2204_v2 = vpop.f32.mrb[46].mxu1  ;;  %v2233_v3 = vmul.f32 %v2217_v63, %v5143_v12  ;;  %v2116_v9 = vadd.f32 %v2115_v1, %v5129_v46  ;;  %v2117_v14 = vpop.f32.mrb[47].mxu0 }
 0x471   :  { %v2235_v7 = vmul.f32 %v2219_v0, %v5143_v12  ;;  %v2205_v13 = vadd.f32 %v2204_v2, %v5129_v46  ;;  %v2206_v44 = vpop.f32.mrb[47].mxu1  ;;  %v2234_v11 = vmul.f32 %v2218_v38, %v5143_v12  ;;  %v2118_v16 = vadd.f32 %v2117_v14, %v5129_v46 }
 0x472   :  { %v2236_v20 = vmul.f32 %v2220_v39, %v5143_v12  ;;  %v2207_v18 = vadd.f32 %v2206_v44, %v5129_v46  ;;  %v2242_v19 = vadd.f32 %v2241_v58, %v2233_v3  ;;  %v2221_v24 = vmax.f32 %v2116_v9, 0.0 }
 0x473   :  { %v2260_v22 = vadd.f32 %v2259_v61, %v2235_v7  ;;  %v2223_v25 = vmax.f32 %v2205_v13, 0.0  ;;  %v2251_v26 = vadd.f32 %v2250_v4, %v2234_v11  ;;  %v2222_v28 = vmax.f32 %v2118_v16, 0.0 }
 0x474   :  { %v2269_v27 = vadd.f32 %v2268_v15, %v2236_v20  ;;  %v2224_v29 = vmax.f32 %v2207_v18, 0.0  ;;  %v2237_v30 = vmul.f32 %v2221_v24, %v5161_v54 }
 0x475   :  { %v2239_v31 = vmul.f32 %v2223_v25, %v5161_v54  ;;  %v2238_v32 = vmul.f32 %v2222_v28, %v5161_v54 }
 0x476   :  { %v2240_v33 = vmul.f32 %v2224_v29, %v5161_v54  ;;  %v2243_v34 = vadd.f32 %v2242_v19, %v2237_v30 }
 0x477   :  { %v2261_v35 = vadd.f32 %v2260_v22, %v2239_v31  ;;  %v2252_v36 = vadd.f32 %v2251_v26, %v2238_v32 }
 0x478   :  { %v2270_v37 = vadd.f32 %v2269_v27, %v2240_v33  ;;  %v2244_v45 = vrot.slane %v2243_v34, 4 }
 0x479   :  { %v2262_v50 = vrot.slane %v2261_v35, 4  ;;  %v2253_v51 = vrot.slane %v2252_v36, 4 }
 0x47a   :  { %v2271_v55 = vrot.slane %v2270_v37, 4  ;;  %v2245_v42 = vadd.f32 %v2244_v45, %v2243_v34 }
 0x47b   :  { %v2263_v57 = vadd.f32 %v2262_v50, %v2261_v35  ;;  %v2254_v60 = vadd.f32 %v2253_v51, %v2252_v36 }
 0x47c   :  { %v2272_v62 = vadd.f32 %v2271_v55, %v2270_v37  ;;  %v2246_v58 = vrot.slane %v2245_v42, 2 }
 0x47d   :  { %v2264_v61 = vrot.slane %v2263_v57, 2  ;;  %v2255_v63 = vrot.slane %v2254_v60, 2 }
 0x47e   :  { %v2273_v0 = vrot.slane %v2272_v62, 2  ;;  %v2247_v4 = vadd.f32 %v2246_v58, %v2245_v42 }
 0x47f   :  { %v2265_v15 = vadd.f32 %v2264_v61, %v2263_v57  ;;  %v2256_v38 = vadd.f32 %v2255_v63, %v2254_v60 }
 0x480   :  { %v2274_v39 = vadd.f32 %v2273_v0, %v2272_v62  ;;  %v2248_v1 = vrot.slane %v2247_v4, 1 }
 0x481   :  { %v2266_v2 = vrot.slane %v2265_v15, 1  ;;  %v2257_v3 = vrot.slane %v2256_v38, 1 }
 0x482   :  { %v2275_v7 = vrot.slane %v2274_v39, 1  ;;  %v2249_v9 = vadd.f32 %v2248_v1, %v2247_v4 }
 0x483   :  { %v2267_v13 = vadd.f32 %v2266_v2, %v2265_v15  ;;  %v2258_v14 = vadd.f32 %v2257_v3, %v2256_v38 }
 0x484   :  { %v2276_v44 = vadd.f32 %v2275_v7, %v2274_v39  ;;  %v2277_v11 = vadd.f32 %v2249_v9, %v5171_v52 }
 0x485   :  { %v2279_v20 = vadd.f32 %v2267_v13, %v5171_v52  ;;  %v2278_v16 = vadd.f32 %v2258_v14, %v5171_v52 }
 0x486   :  { %v2280_v18 = vadd.f32 %v2276_v44, %v5171_v52 }
 0x487   :  { %v2285_v19 = vcombine.low %v2277_v11, %v2278_v16 }
 0x488   :  { %v2286_v22 = vcombine.low %v2279_v20, %v2280_v18 }
 0x489   :  { %v2293_v24 = vrot.slane %v2285_v19, %v5175_v5 }
 0x48a   :  { %v2300_v25 = vrot.slane %v2286_v22, %v5175_v5 }
 0x48c   :  { %v2301_v26 = vcombine.low %v2293_v24, %v2300_v25 }
 0x48e   :  { %v2308_v27 = vrot.slane %v2301_v26, %v5175_v5 }
 0x490   :  { %2311 = vst.msk [vmem:[#allocation2 + $0x8] sm:$0xf] %vm5181_vm3, %v2308_v27 }
 0x4a8   :  { %v2635_v28 = vpop.f32.mrb[48].mxu0 }
 0x4a9   :  { %v2724_v29 = vpop.f32.mrb[48].mxu1  ;;  %v2637_v30 = vpop.f32.mrb[49].mxu0  ;;  %v2636_v32 = vadd.f32 %v2635_v28, %v4766_v49 }
 0x4aa   :  { %v2726_v31 = vpop.f32.mrb[49].mxu1  ;;  %v2725_v33 = vadd.f32 %v2724_v29, %v4766_v49  ;;  %v2638_v34 = vadd.f32 %v2637_v30, %v4766_v49 }
 0x4ab   :  { %v2727_v35 = vadd.f32 %v2726_v31, %v4766_v49  ;;  %v2747_v60 = vmax.f32 %v2636_v32, 0.0 }
 0x4ac   :  { %v2641_v36 = vpop.f32.mrb[50].mxu0  ;;  %v2749_v62 = vmax.f32 %v2725_v33, 0.0  ;;  %v2748_v63 = vmax.f32 %v2638_v34, 0.0 }
 0x4ad   :  { %v2730_v37 = vpop.f32.mrb[50].mxu1  ;;  %v2642_v45 = vadd.f32 %v2641_v36, %v4769_v53  ;;  %v2643_v51 = vpop.f32.mrb[51].mxu0  ;;  %v2750_v0 = vmax.f32 %v2727_v35, 0.0 }
 0x4ae   :  { %v2731_v50 = vadd.f32 %v2730_v37, %v4769_v53  ;;  %v2732_v55 = vpop.f32.mrb[51].mxu1  ;;  %v2644_v42 = vadd.f32 %v2643_v51, %v4769_v53 }
 0x4af   :  { %v2733_v57 = vadd.f32 %v2732_v55, %v4769_v53  ;;  %v2751_v58 = vmax.f32 %v2642_v45, 0.0 }
 0x4b0   :  { %v2753_v61 = vmax.f32 %v2731_v50, 0.0  ;;  %v2752_v4 = vmax.f32 %v2644_v42, 0.0  ;;  %v2647_v15 = vpop.f32.mrb[52].mxu0 }
 0x4b1   :  { %v2754_v49 = vmax.f32 %v2733_v57, 0.0  ;;  %v2736_v38 = vpop.f32.mrb[52].mxu1  ;;  %v4324_v39 = vpack.c.bf16 %v2751_v58, %v2747_v60  ;;  %v2649_v2 = vpop.f32.mrb[53].mxu0  ;;  %v2648_v13 = vadd.f32 %v2647_v15, %v4773_v59 }
 0x4b2   :  { %v4332_v1 = vpack.c.bf16 %v2753_v61, %v2749_v62  ;;  %v2738_v3 = vpop.f32.mrb[53].mxu1  ;;  %v4322_v7 = vpack.c.bf16 %v2752_v4, %v2748_v63  ;;  %v2737_v53 = vadd.f32 %v2736_v38, %v4773_v59  ;;  %v2650_v14 = vadd.f32 %v2649_v2, %v4773_v59 }
 0x4b3   :  { %v4330_v9 = vpack.c.bf16 %v2754_v49, %v2750_v0  ;;  %v2739_v44 = vadd.f32 %v2738_v3, %v4773_v59  ;;  %v2755_v26 = vmax.f32 %v2648_v13, 0.0 }
 0x4b4   :  { %v2653_v11 = vpop.f32.mrb[54].mxu0  ;;  %4323 = vmatprep.subr.bf16.mxu0 %v4322_v7  ;;  %v2757_v27 = vmax.f32 %v2737_v53, 0.0  ;;  %v2756_v29 = vmax.f32 %v2650_v14, 0.0 }
 0x4b5   :  { %v2742_v20 = vpop.f32.mrb[54].mxu1  ;;  %4331 = vmatprep.subr.bf16.mxu1 %v4330_v9  ;;  %v2654_v16 = vadd.f32 %v2653_v11, %v4783_v23  ;;  %v2655_v19 = vpop.f32.mrb[55].mxu0  ;;  %4325 = vmatpush1.bf16.msra.mxu0 %v4324_v39  ;;  %v2758_v30 = vmax.f32 %v2739_v44, 0.0 }
 0x4b6   :  { %v2743_v18 = vadd.f32 %v2742_v20, %v4783_v23  ;;  %v2744_v22 = vpop.f32.mrb[55].mxu1  ;;  %4333 = vmatpush1.bf16.msra.mxu1 %v4332_v1  ;;  %v2656_v24 = vadd.f32 %v2655_v19, %v4783_v23 }
 0x4b7   :  { %v2745_v25 = vadd.f32 %v2744_v22, %v4783_v23  ;;  %v2759_v28 = vmax.f32 %v2654_v16, 0.0 }
 0x4b8   :  { %v2761_v59 = vmax.f32 %v2743_v18, 0.0  ;;  %v2760_v31 = vmax.f32 %v2656_v24, 0.0 }
 0x4b9   :  { %v2762_v32 = vmax.f32 %v2745_v25, 0.0  ;;  %v4328_v33 = vpack.c.bf16 %v2759_v28, %v2755_v26 }
 0x4ba   :  { %v4336_v34 = vpack.c.bf16 %v2761_v59, %v2757_v27  ;;  %v4326_v35 = vpack.c.bf16 %v2760_v31, %v2756_v29 }
 0x4bb   :  { %v4334_v36 = vpack.c.bf16 %v2762_v32, %v2758_v30 }
 0x4bc   :  { %4327 = vmatprep.subr.bf16.mxu0 %v4326_v35 }
 0x4bd   :  { %4335 = vmatprep.subr.bf16.mxu1 %v4334_v36  ;;  %4329 = vmatpush1.bf16.msra.mxu0 %v4328_v33 }
 0x4be   :  { %4337 = vmatpush1.bf16.msra.mxu1 %v4336_v34 }
 0x4c0   :  { %3562 = vmatmul.mubr.msk.f32.vlgmr.msra.gmra.mrb[56].mxu0 %vm530_vm2, %v5627_v56 }
 0x4c1   :  { %3566 = vmatmul.mubr.msk.f32.vlgmr.msra.gmra.mrb[56].mxu1 %vm530_vm2, %v5627_v56  ;;  %2833 = vmatprep.mubr.f32.mxu0 %v4385_v43 }
 0x4c2   :  { %2922 = vmatprep.mubr.f32.mxu1 %v4385_v43 }
 0x4c4   :  { %3563 = vmatmul.mubr.msk.f32.gmra.mrb[58].mxu0 %vm530_vm2, %v5647_v6 }
 0x4c5   :  { %3567 = vmatmul.mubr.msk.f32.gmra.mrb[58].mxu1 %vm530_vm2, %v5647_v6  ;;  %2839 = vmatprep.mubr.f32.mxu0 %v4385_v43 }
 0x4c6   :  { %2928 = vmatprep.mubr.f32.mxu1 %v4385_v43 }
 0x4c8   :  { %3564 = vmatmul.mubr.msk.f32.gmra.mrb[60].mxu0 %vm530_vm2, %v5681_v10 }
 0x4c9   :  { %3568 = vmatmul.mubr.msk.f32.gmra.mrb[60].mxu1 %vm530_vm2, %v5681_v10  ;;  %2845 = vmatprep.mubr.f32.mxu0 %v4385_v43 }
 0x4ca   :  { %2934 = vmatprep.mubr.f32.mxu1 %v4385_v43 }
 0x4cc   :  { %3565 = vmatmul.mubr.msk.f32.gmra.mrb[62].mxu0 %vm530_vm2, %v5701_v21 }
 0x4cd   :  { %3569 = vmatmul.mubr.msk.f32.gmra.mrb[62].mxu1 %vm530_vm2, %v5701_v21 }
 0x593   :  { %v2829_v23 = vpop.f32.mrb[56].mxu0 }
 0x594   :  { %v2918_v56 = vpop.f32.mrb[56].mxu1  ;;  %v2830_v6 = vadd.f32 %v2829_v23, %v5125_v40  ;;  %v2831_v45 = vpop.f32.mrb[57].mxu0 }
 0x595   :  { %v2919_v37 = vadd.f32 %v2918_v56, %v5125_v40  ;;  %v2920_v50 = vpop.f32.mrb[57].mxu1  ;;  %v2832_v10 = vadd.f32 %v2831_v45, %v5125_v40 }
 0x596   :  { %v2921_v51 = vadd.f32 %v2920_v50, %v5125_v40  ;;  %v2941_v55 = vmax.f32 %v2830_v6, 0.0 }
 0x597   :  { %v2943_v43 = vmax.f32 %v2919_v37, 0.0  ;;  %v2942_v42 = vmax.f32 %v2832_v10, 0.0  ;;  %v2835_v60 = vpop.f32.mrb[58].mxu0 }
 0x598   :  { %v2944_v57 = vmax.f32 %v2921_v51, 0.0  ;;  %v2924_v62 = vpop.f32.mrb[58].mxu1  ;;  %v2836_v21 = vadd.f32 %v2835_v60, %v5123_v48  ;;  %v2837_v61 = vpop.f32.mrb[59].mxu0  ;;  %v2957_v49 = vmul.f32 %v2941_v55, %v5131_v47 }
 0x599   :  { %v2925_v58 = vadd.f32 %v2924_v62, %v5123_v48  ;;  %v2926_v63 = vpop.f32.mrb[59].mxu1  ;;  %v2838_v0 = vadd.f32 %v2837_v61, %v5123_v48  ;;  %v2959_v40 = vmul.f32 %v2943_v43, %v5131_v47  ;;  %v2958_v39 = vmul.f32 %v2942_v42, %v5131_v47 }
 0x59a   :  { %v2927_v4 = vadd.f32 %v2926_v63, %v5123_v48  ;;  %v2945_v15 = vmax.f32 %v2836_v21, 0.0  ;;  %v2960_v1 = vmul.f32 %v2944_v57, %v5131_v47 }
 0x59b   :  { %v2947_v38 = vmax.f32 %v2925_v58, 0.0  ;;  %v2946_v2 = vmax.f32 %v2838_v0, 0.0  ;;  %v2841_v7 = vpop.f32.mrb[60].mxu0 }
 0x59c   :  { %v2948_v3 = vmax.f32 %v2927_v4, 0.0  ;;  %v2930_v9 = vpop.f32.mrb[60].mxu1  ;;  %v2961_v13 = vmul.f32 %v2945_v15, %v5141_v8  ;;  %v2842_v48 = vadd.f32 %v2841_v7, %v5127_v41  ;;  %v2843_v44 = vpop.f32.mrb[61].mxu0 }
 0x59d   :  { %v2963_v53 = vmul.f32 %v2947_v38, %v5141_v8  ;;  %v2931_v14 = vadd.f32 %v2930_v9, %v5127_v41  ;;  %v2932_v11 = vpop.f32.mrb[61].mxu1  ;;  %v2962_v20 = vmul.f32 %v2946_v2, %v5141_v8  ;;  %v2844_v47 = vadd.f32 %v2843_v44, %v5127_v41 }
 0x59e   :  { %v2964_v16 = vmul.f32 %v2948_v3, %v5141_v8  ;;  %v2933_v18 = vadd.f32 %v2932_v11, %v5127_v41  ;;  %v2973_v19 = vadd.f32 %v2961_v13, %v2957_v49  ;;  %v2949_v24 = vmax.f32 %v2842_v48, 0.0 }
 0x59f   :  { %v2991_v22 = vadd.f32 %v2963_v53, %v2959_v40  ;;  %v2951_v25 = vmax.f32 %v2931_v14, 0.0  ;;  %v2982_v26 = vadd.f32 %v2962_v20, %v2958_v39  ;;  %v2950_v28 = vmax.f32 %v2844_v47, 0.0  ;;  %v2847_v29 = vpop.f32.mrb[62].mxu0 }
 0x5a0   :  { %v3000_v27 = vadd.f32 %v2964_v16, %v2960_v1  ;;  %v2952_v59 = vmax.f32 %v2933_v18, 0.0  ;;  %v2936_v30 = vpop.f32.mrb[62].mxu1  ;;  %v2965_v31 = vmul.f32 %v2949_v24, %v5143_v12  ;;  %v2848_v8 = vadd.f32 %v2847_v29, %v5129_v46  ;;  %v2849_v34 = vpop.f32.mrb[63].mxu0 }
 0x5a1   :  { %v2967_v32 = vmul.f32 %v2951_v25, %v5143_v12  ;;  %v2937_v33 = vadd.f32 %v2936_v30, %v5129_v46  ;;  %v2938_v41 = vpop.f32.mrb[63].mxu1  ;;  %v2966_v35 = vmul.f32 %v2950_v28, %v5143_v12  ;;  %v2850_v23 = vadd.f32 %v2849_v34, %v5129_v46 }
 0x5a2   :  { %v2968_v36 = vmul.f32 %v2952_v59, %v5143_v12  ;;  %v2939_v56 = vadd.f32 %v2938_v41, %v5129_v46  ;;  %v2974_v6 = vadd.f32 %v2973_v19, %v2965_v31  ;;  %v2953_v45 = vmax.f32 %v2848_v8, 0.0 }
 0x5a3   :  { %v2992_v37 = vadd.f32 %v2991_v22, %v2967_v32  ;;  %v2955_v50 = vmax.f32 %v2937_v33, 0.0  ;;  %v2983_v10 = vadd.f32 %v2982_v26, %v2966_v35  ;;  %v2954_v55 = vmax.f32 %v2850_v23, 0.0 }
 0x5a4   :  { %v3001_v51 = vadd.f32 %v3000_v27, %v2968_v36  ;;  %v2956_v43 = vmax.f32 %v2939_v56, 0.0  ;;  %v2969_v42 = vmul.f32 %v2953_v45, %v5161_v54 }
 0x5a5   :  { %v2971_v57 = vmul.f32 %v2955_v50, %v5161_v54  ;;  %v2970_v60 = vmul.f32 %v2954_v55, %v5161_v54 }
 0x5a6   :  { %v2972_v12 = vmul.f32 %v2956_v43, %v5161_v54  ;;  %v2975_v62 = vadd.f32 %v2974_v6, %v2969_v42 }
 0x5a7   :  { %v2993_v21 = vadd.f32 %v2992_v37, %v2971_v57  ;;  %v2984_v58 = vadd.f32 %v2983_v10, %v2970_v60 }
 0x5a8   :  { %v3002_v46 = vadd.f32 %v3001_v51, %v2972_v12  ;;  %v2976_v61 = vrot.slane %v2975_v62, 4 }
 0x5a9   :  { %v2994_v63 = vrot.slane %v2993_v21, 4  ;;  %v2985_v0 = vrot.slane %v2984_v58, 4 }
 0x5aa   :  { %v3003_v4 = vrot.slane %v3002_v46, 4  ;;  %v2977_v49 = vadd.f32 %v2976_v61, %v2975_v62 }
 0x5ab   :  { %v2995_v40 = vadd.f32 %v2994_v63, %v2993_v21  ;;  %v2986_v15 = vadd.f32 %v2985_v0, %v2984_v58 }
 0x5ac   :  { %v3004_v38 = vadd.f32 %v3003_v4, %v3002_v46  ;;  %v2978_v39 = vrot.slane %v2977_v49, 2 }
 0x5ad   :  { %v2996_v1 = vrot.slane %v2995_v40, 2  ;;  %v2987_v2 = vrot.slane %v2986_v15, 2 }
 0x5ae   :  { %v3005_v3 = vrot.slane %v3004_v38, 2  ;;  %v2979_v7 = vadd.f32 %v2978_v39, %v2977_v49 }
 0x5af   :  { %v2997_v9 = vadd.f32 %v2996_v1, %v2995_v40  ;;  %v2988_v13 = vadd.f32 %v2987_v2, %v2986_v15 }
 0x5b0   :  { %v3006_v54 = vadd.f32 %v3005_v3, %v3004_v38  ;;  %v2980_v53 = vrot.slane %v2979_v7, 1 }
 0x5b1   :  { %v2998_v48 = vrot.slane %v2997_v9, 1  ;;  %v2989_v14 = vrot.slane %v2988_v13, 1 }
 0x5b2   :  { %v3007_v44 = vrot.slane %v3006_v54, 1  ;;  %v2981_v11 = vadd.f32 %v2980_v53, %v2979_v7 }
 0x5b3   :  { %v2999_v20 = vadd.f32 %v2998_v48, %v2997_v9  ;;  %v2990_v16 = vadd.f32 %v2989_v14, %v2988_v13 }
 0x5b4   :  { %v3008_v47 = vadd.f32 %v3007_v44, %v3006_v54  ;;  %v3009_v18 = vadd.f32 %v2981_v11, %v5171_v52 }
 0x5b5   :  { %v3011_v19 = vadd.f32 %v2999_v20, %v5171_v52  ;;  %v3010_v22 = vadd.f32 %v2990_v16, %v5171_v52 }
 0x5b6   :  { %v3012_v24 = vadd.f32 %v3008_v47, %v5171_v52 }
 0x5b7   :  { %v3017_v25 = vcombine.low %v3009_v18, %v3010_v22 }
 0x5b8   :  { %v3018_v26 = vcombine.low %v3011_v19, %v3012_v24 }
 0x5b9   :  { %v3025_v27 = vrot.slane %v3017_v25, %v5175_v5 }
 0x5ba   :  { %v3032_v28 = vrot.slane %v3018_v26, %v5175_v5 }
 0x5bc   :  { %v3033_v59 = vcombine.low %v3025_v27, %v3032_v28 }
 0x5be   :  { %v3040_v29 = vrot.slane %v3033_v59, %v5175_v5 }
 0x5c0   :  { %3043 = vst.msk [vmem:[#allocation2 + $0xc] sm:$0xf] %vm5181_vm3, %v3040_v29 }
 0x5c1   :  { %4371 = shalt.err (!%p4368_p4)
}
 0x5c2   :  { %s4372_s29 = scalar_lea.hbm %s6061_s4, 256 }
 0x5c3   :  { %p4373_p5 = scmp.ne.s32.totalorder %s6061_s4, %s4372_s29  ;;  %p4376_p6 = scmp.lt.u32.totalorder %s4372_s29, %s6061_s4 }
 0x5c5   :  { %p4378_p7 = pnand %p4376_p6, %p4373_p5 }
 0x5c7   :  { %4381 = shalt.err (!%p4378_p7)
}
 0x5c8   :  { %3053 = dma.vmem_to_hbm [thread:$0]  %s3051_s25, 256, %s6061_s4, [#allocation3]  }
 0x5c9   :  { %4382 = dma.done.wait [#allocation3], 256  }
 0x5ca   :  { %4383 = vsyncadd [#allocation3], 4294967040 }
 0x5cb   :  { %3057 = vsyncpa [#allocation3], 1 }

</bundles_post_ra>
